<compile_context>
chip_gen: v5e
topology: v5e:2x2
jax: 0.10.0
libtpu: 0.0.40
codegen_flags: <defaults>
</compile_context>

<pallas_src>
import functools

import jax
import jax.numpy as jnp
from jax.experimental import pallas as pl
from jax.experimental.pallas import tpu as pltpu


# ----------------------------- configuration ------------------------------ #
B        = 2     # batch
V        = 32    # vertices
C_IN     = 3     # input channels (verts xyz)
C_OUT    = 4     # output channels
HIDDEN   = 32    # hidden_channels
K_EIG    = 16    # number of eigenpairs
N_BLOCK  = 2     # number of DiffusionNet blocks


# ------------------------------ Pallas kernel ----------------------------- #
def diffusionnet_kernel(
    # batch-varying tensors (leading dim = batch chunk `bb`)
    verts_ref,    # [bb*V, C_IN]        batch folded into rows
    evecs_ref,    # [bb, V, K]
    evecstm_ref,  # [bb, K, V]          evecs^T pre-scaled by mass
    coefs_ref,    # [bb, N_BLOCK*K, H]  precomputed exp(-evals * t_c)
    gradxy_ref,   # [bb, 2V, V]         gradX stacked over gradY along rows
    # packed parameters (broadcast across the grid)
    w_first_ref,  # [C_IN, H]                 (x @ W layout)
    w_rot_ref,    # [N_BLOCK, H, 2H]          per block [A_re | A_im]
    w_hh_ref,     # [N_BLOCK*5 + 1, H, H]     per block: w0x,w0fd,w0fg,w1,w2 ; last: padded w_last
    vec_ref,      # [N_BLOCK*3 + 2, H]        per block: b0,b1,b2 ; then b_first, padded b_last
    # output
    out_ref,      # [bb*V, H]                 lane-dense; wrapper slices C_OUT
    *,
    n_block,
):
    f32 = jnp.float32
    bb, n_v, k_eig = evecs_ref.shape
    h = w_first_ref.shape[1]
    bbv = bb * n_v

    b_first = vec_ref[pl.ds(3 * n_block, 1), :]       # [1, H]
    b_last  = vec_ref[pl.ds(3 * n_block + 1, 1), :]   # [1, H]  (zero past C_OUT)
    w_last  = w_hh_ref[5 * n_block]                   # [H, H]  (zero past C_OUT)

    # ---- first_linear, whole batch chunk in one matmul ----
    x = jnp.dot(verts_ref[...], w_first_ref[...],
                preferred_element_type=f32) + b_first            # [bb*V, H]

    def _cat(parts):
        return parts[0] if len(parts) == 1 else jnp.concatenate(parts, axis=0)

    for blk in range(n_block):
        base = 5 * blk
        w0x  = w_hh_ref[base + 0]
        w0fd = w_hh_ref[base + 1]
        w0fg = w_hh_ref[base + 2]
        w1   = w_hh_ref[base + 3]
        w2   = w_hh_ref[base + 4]
        a_cat = w_rot_ref[blk]                            # [H, 2H]
        b0 = vec_ref[pl.ds(3 * blk + 0, 1), :]
        b1 = vec_ref[pl.ds(3 * blk + 1, 1), :]
        b2 = vec_ref[pl.ds(3 * blk + 2, 1), :]

        # ---- LearnedTimeDiffusion + gradients: batch-specific LHS, per-batch ----
        fdiff_parts, gx_parts, gy_parts = [], [], []
        for b in range(bb):
            x_b = x[b * n_v:(b + 1) * n_v]                                        # [V, H]
            fspec = jnp.dot(evecstm_ref[b], x_b, preferred_element_type=f32)       # [K, H]
            coef = coefs_ref[b][blk * k_eig:(blk + 1) * k_eig]                     # [K, H]
            fdiff_b = jnp.dot(evecs_ref[b], coef * fspec,
                              preferred_element_type=f32)                          # [V, H]
            gres = jnp.dot(gradxy_ref[b], fdiff_b, preferred_element_type=f32)     # [2V, H]
            fdiff_parts.append(fdiff_b)
            gx_parts.append(gres[:n_v])
            gy_parts.append(gres[n_v:])
        fdiff = _cat(fdiff_parts)                         # [bb*V, H]
        gx = _cat(gx_parts)                               # [bb*V, H]
        gy = _cat(gy_parts)                               # [bb*V, H]

        # ---- SpatialGradientFeatures: one combined rotation matmul ----
        rot = jnp.dot(jnp.concatenate([gx, gy], axis=0), a_cat,
                      preferred_element_type=f32)         # [2*bb*V, 2H]
        gx_re = rot[:bbv, :h]                             # gx @ A_re
        gy_im = rot[bbv:, h:]                             # gy @ A_im
        fgrad = jnp.tanh(gx * (gx_re - gy_im) + gy * (gx_re + gy_im))

        # ---- MiniMLP (lane-concat replaced by 3 summed dots) + residual ----
        h0 = jnp.maximum(
            jnp.dot(x,     w0x,  preferred_element_type=f32)
            + jnp.dot(fdiff, w0fd, preferred_element_type=f32)
            + jnp.dot(fgrad, w0fg, preferred_element_type=f32) + b0, 0.0)
        h1 = jnp.maximum(jnp.dot(h0, w1, preferred_element_type=f32) + b1, 0.0)
        x = x + jnp.dot(h1, w2, preferred_element_type=f32) + b2

    # ---- last_linear, lane-dense store (padded to H; wrapper slices C_OUT) ----
    out_ref[...] = jnp.dot(x, w_last, preferred_element_type=f32) + b_last


# ------------------------------- packing ----------------------------------- #
def pack_params(params):
    """Pack the parameter tensors into 4 slabs (fewer tiny DMAs / BlockSpecs)."""
    f32 = jnp.float32
    n_block, h, _ = params["w_mlp1"].shape
    c_out = params["w_last"].shape[1]

    # HxH slab: per block [w0_x, w0_fdiff, w0_fgrad, w1, w2], then padded w_last.
    w0 = params["w_mlp0"].reshape(n_block, 3, h, h)   # row-slices for x / fdiff / fgrad
    w_last_pad = jnp.zeros((1, h, h), f32).at[0, :, :c_out].set(params["w_last"])
    w_hh = jnp.concatenate(
        [w0, params["w_mlp1"][:, None], params["w_mlp2"][:, None]],
        axis=1).reshape(n_block * 5, h, h)
    w_hh = jnp.concatenate([w_hh, w_last_pad], axis=0)          # [N_BLOCK*5 + 1, H, H]

    # Rotation slab: [A_re | A_im] side-by-side along lanes (one matmul per block).
    w_rot = jnp.concatenate([params["a_re"], params["a_im"]], axis=-1)  # [N_BLOCK, H, 2H]

    # Vector slab: per block [b0, b1, b2], then b_first, padded b_last.
    b_last_pad = jnp.zeros((1, h), f32).at[:, :c_out].set(params["b_last"])
    vec = jnp.concatenate(
        [params["b_mlp0"], params["b_mlp1"], params["b_mlp2"]],
        axis=1).reshape(n_block * 3, h)
    vec = jnp.concatenate([vec, params["b_first"], b_last_pad], axis=0)  # [N_BLOCK*3+2, H]

    return {
        "w_first": params["w_first"].astype(f32),
        "w_rot": w_rot.astype(f32),
        "w_hh": w_hh.astype(f32),
        "vec": vec.astype(f32),
        "n_block": n_block,
        "c_out": c_out,
    }


def prepare_operators(mass, evals, evecs, gradX, gradY, diffusion_time):
    """Per-mesh precompute, hoisted OUT of the forward path (operators are fixed
    per mesh): evecs^T with mass folded in, diffusion-coefficient table, and the
    gradX/gradY row-stack used to produce gx & gy from one matmul."""
    f32 = jnp.float32
    dt = jnp.maximum(diffusion_time, 1e-8)               # torch.clamp in forward
    evecs_t = jnp.swapaxes(evecs, -1, -2)                # [B, K, V]
    evecstm = (evecs_t * mass[:, None, :]).astype(f32)   # fold mass into evecs^T
    coefs = jnp.exp(-evals[:, None, :, None] * dt[None, :, None, :])   # [B, NB, K, H]
    b, nb, k, h = coefs.shape
    coefs = coefs.reshape(b, nb * k, h).astype(f32)
    grad_xy = jnp.concatenate([gradX, gradY], axis=1).astype(f32)      # [B, 2V, V]
    return {
        "evecs": evecs.astype(f32),
        "evecstm": evecstm,
        "coefs": coefs,
        "grad_xy": grad_xy,
    }


# ------------------------------- wrapper ----------------------------------- #
def _pick_batch_block(b, v, k, h, n_block, c_in, budget_bytes=6 << 20):
    """VMEM-footprint-based batch chunk: largest bb dividing b whose per-step
    batch-varying footprint fits the budget (leaves headroom for BlockSpec
    double-buffering under default scoped-VMEM limits on v5e/v6e/v7x)."""
    per_batch = 4 * (v * c_in + v * k + k * v + n_block * k * h + 2 * v * v + v * h)
    bb = int(max(1, min(b, budget_bytes // max(per_batch, 1))))
    while b % bb:
        bb -= 1
    return bb


def diffusionnet_forward(verts, ops, packed, batch_block=None):
    b, v, c_in = verts.shape
    k = ops["evecs"].shape[-1]
    h = packed["w_first"].shape[1]
    n_block = packed["n_block"]
    c_out = packed["c_out"]

    bb = batch_block if batch_block is not None else _pick_batch_block(
        b, v, k, h, n_block, c_in)
    if bb < 1 or b % bb != 0:
        bb = 1

    verts_f = verts.reshape(b * v, c_in).astype(jnp.float32)   # batch folded into rows

    batch3 = lambda d0, d1: pl.BlockSpec((bb, d0, d1), lambda i: (i, 0, 0))
    param2 = lambda d0, d1: pl.BlockSpec((d0, d1), lambda i: (0, 0))
    param3 = lambda d0, d1, d2: pl.BlockSpec((d0, d1, d2), lambda i: (0, 0, 0))

    in_specs = [
        pl.BlockSpec((bb * v, c_in), lambda i: (i, 0)),   # verts (folded)
        batch3(v, k),                                     # evecs
        batch3(k, v),                                     # evecs^T * mass
        batch3(n_block * k, h),                           # diffusion coefficients
        batch3(2 * v, v),                                 # gradX / gradY stacked
        param2(c_in, h),                                  # w_first
        param3(n_block, h, 2 * h),                        # [A_re | A_im]
        param3(n_block * 5 + 1, h, h),                    # packed HxH weights
        param2(n_block * 3 + 2, h),                       # packed biases
    ]
    out_spec = pl.BlockSpec((bb * v, h), lambda i: (i, 0))

    kernel = functools.partial(diffusionnet_kernel, n_block=n_block)

    out = pl.pallas_call(
        kernel,
        out_shape=jax.ShapeDtypeStruct((b * v, h), jnp.float32),
        grid_spec=pltpu.PrefetchScalarGridSpec(
            num_scalar_prefetch=0,
            grid=(b // bb,),
            in_specs=in_specs,
            out_specs=out_spec,
        ),
        compiler_params=pltpu.CompilerParams(
            dimension_semantics=("parallel",)),
    )(verts_f, ops["evecs"], ops["evecstm"], ops["coefs"], ops["grad_xy"],
      packed["w_first"], packed["w_rot"], packed["w_hh"], packed["vec"])

    # Lane-dense kernel output; slicing the real channels here is free XLA plumbing.
    return out.reshape(b, v, h)[:, :, :c_out]


# --------------------------- pure-JAX reference ---------------------------- #
def diffusionnet_reference(verts, mass, evals, evecs, gradX, gradY, params):
    n_block = params["diffusion_time"].shape[0]
    x = verts @ params["w_first"] + params["b_first"]
    dt = jnp.maximum(params["diffusion_time"], 1e-8)
    for i in range(n_block):
        fm = x * mass[..., None]
        fspec = jnp.einsum("bvk,bvh->bkh", evecs, fm)
        coefs = jnp.exp(-evals[..., None] * dt[i][None, None, :])
        fdiff = jnp.einsum("bvk,bkh->bvh", evecs, coefs * fspec)
        gx = jnp.einsum("bvw,bwh->bvh", gradX, fdiff)
        gy = jnp.einsum("bvw,bwh->bvh", gradY, fdiff)
        real_b = gx @ params["a_re"][i] - gy @ params["a_im"][i]
        img_b  = gx @ params["a_re"][i] + gy @ params["a_im"][i]
        fgrad = jnp.tanh(gx * real_b + gy * img_b)
        comb = jnp.concatenate([x, fdiff, fgrad], axis=-1)
        hh = jax.nn.relu(comb @ params["w_mlp0"][i] + params["b_mlp0"][i])
        hh = jax.nn.relu(hh @ params["w_mlp1"][i] + params["b_mlp1"][i])
        hh = hh @ params["w_mlp2"][i] + params["b_mlp2"][i]
        x = hh + x
    return x @ params["w_last"] + params["b_last"]


# ------------------------------- main -------------------------------------- #
if __name__ == "__main__":
    key = jax.random.PRNGKey(0)
    ks = jax.random.split(key, 24)

    f32 = jnp.float32
    scale = 0.05

    # inputs
    verts = jax.random.normal(ks[0], (B, V, C_IN), f32)
    mass  = jax.random.uniform(ks[1], (B, V), f32, 0.5, 1.5)
    evals = jax.random.uniform(ks[2], (B, K_EIG), f32, 0.0, 2.0)
    evecs = jax.random.normal(ks[3], (B, V, K_EIG), f32) / jnp.sqrt(V)
    gradX = jax.random.normal(ks[4], (B, V, V), f32) / jnp.sqrt(V)
    gradY = jax.random.normal(ks[5], (B, V, V), f32) / jnp.sqrt(V)

    H = HIDDEN
    params = {
        # nn.Linear weight is [out, in]; we store the transpose so kernels do x @ W.
        "w_first": scale * jax.random.normal(ks[6], (C_IN, H), f32),
        "b_first": scale * jax.random.normal(ks[7], (1, H), f32),
        "diffusion_time": jnp.abs(0.1 * jax.random.normal(ks[8], (N_BLOCK, H), f32)),
        "a_re": scale * jax.random.normal(ks[9],  (N_BLOCK, H, H), f32),
        "a_im": scale * jax.random.normal(ks[10], (N_BLOCK, H, H), f32),
        "w_mlp0": scale * jax.random.normal(ks[11], (N_BLOCK, 3 * H, H), f32),
        "b_mlp0": scale * jax.random.normal(ks[12], (N_BLOCK, 1, H), f32),
        "w_mlp1": scale * jax.random.normal(ks[13], (N_BLOCK, H, H), f32),
        "b_mlp1": scale * jax.random.normal(ks[14], (N_BLOCK, 1, H), f32),
        "w_mlp2": scale * jax.random.normal(ks[15], (N_BLOCK, H, H), f32),
        "b_mlp2": scale * jax.random.normal(ks[16], (N_BLOCK, 1, H), f32),
        "w_last": scale * jax.random.normal(ks[17], (H, C_OUT), f32),
        "b_last": scale * jax.random.normal(ks[18], (1, C_OUT), f32),
    }

    # one-time (per-mesh / per-checkpoint) prep, hoisted out of the forward path
    packed = pack_params(params)
    ops = prepare_operators(mass, evals, evecs, gradX, gradY, params["diffusion_time"])

    out = diffusionnet_forward(verts, ops, packed)
    out = jax.block_until_ready(out)

    ref = diffusionnet_reference(verts, mass, evals, evecs, gradX, gradY, params)
    assert out.shape == (B, V, C_OUT)
    assert jnp.allclose(out, ref, rtol=1e-3, atol=1e-3), (
        f"max abs diff {jnp.max(jnp.abs(out - ref))}")

    print("KERNEL_OK")
</pallas_src>

<mosaic_0001>
module attributes {stable_mosaic.version = 11 : i64} {
  func.func @diffusionnet_kernel(%arg0: i32, %arg1: memref<64x3xf32, #tpu.memory_space<vmem>>, %arg2: memref<2x32x16xf32, #tpu.memory_space<vmem>>, %arg3: memref<2x16x32xf32, #tpu.memory_space<vmem>>, %arg4: memref<2x32x32xf32, #tpu.memory_space<vmem>>, %arg5: memref<2x64x32xf32, #tpu.memory_space<vmem>>, %arg6: memref<3x32xf32, #tpu.memory_space<vmem>>, %arg7: memref<2x32x64xf32, #tpu.memory_space<vmem>>, %arg8: memref<11x32x32xf32, #tpu.memory_space<vmem>>, %arg9: memref<8x32xf32, #tpu.memory_space<vmem>>, %arg10: memref<64x32xf32, #tpu.memory_space<vmem>>) attributes {dimension_semantics = [#tpu.dimension_semantics<parallel>], iteration_bounds = array<i64: 1>, scalar_prefetch = 0 : i64, scratch_operands = 0 : i64, tpu.core_type = #tpu.core_type<tc>, window_params = [{transform_indices = @transform_0, window_bounds = array<i64: 64, 3>}, {transform_indices = @transform_1, window_bounds = array<i64: 2, 32, 16>}, {transform_indices = @transform_2, window_bounds = array<i64: 2, 16, 32>}, {transform_indices = @transform_3, window_bounds = array<i64: 2, 32, 32>}, {transform_indices = @transform_4, window_bounds = array<i64: 2, 64, 32>}, {pipeline_mode = #tpu.pipeline_mode<synchronous>, transform_indices = @transform_5, window_bounds = array<i64: 3, 32>}, {pipeline_mode = #tpu.pipeline_mode<synchronous>, transform_indices = @transform_6, window_bounds = array<i64: 2, 32, 64>}, {pipeline_mode = #tpu.pipeline_mode<synchronous>, transform_indices = @transform_7, window_bounds = array<i64: 11, 32, 32>}, {pipeline_mode = #tpu.pipeline_mode<synchronous>, transform_indices = @transform_8, window_bounds = array<i64: 8, 32>}, {transform_indices = @transform_9, window_bounds = array<i64: 64, 32>}]} {
    %c6 = arith.constant 6 : index
    %c0 = arith.constant 0 : index
    %0 = vector.load %arg9[%c6, %c0] : memref<8x32xf32, #tpu.memory_space<vmem>>, vector<1x32xf32>
    %c7 = arith.constant 7 : index
    %c0_0 = arith.constant 0 : index
    %1 = vector.load %arg9[%c7, %c0_0] : memref<8x32xf32, #tpu.memory_space<vmem>>, vector<1x32xf32>
    %c10 = arith.constant 10 : index
    %c0_1 = arith.constant 0 : index
    %c0_2 = arith.constant 0 : index
    %2 = vector.load %arg8[%c10, %c0_1, %c0_2] : memref<11x32x32xf32, #tpu.memory_space<vmem>>, vector<1x32x32xf32>
    %3 = vector.shape_cast %2 : vector<1x32x32xf32> to vector<32x32xf32>
    %c0_3 = arith.constant 0 : index
    %c0_4 = arith.constant 0 : index
    %4 = vector.load %arg1[%c0_3, %c0_4] : memref<64x3xf32, #tpu.memory_space<vmem>>, vector<64x3xf32>
    %c0_5 = arith.constant 0 : index
    %c0_6 = arith.constant 0 : index
    %5 = vector.load %arg6[%c0_5, %c0_6] : memref<3x32xf32, #tpu.memory_space<vmem>>, vector<3x32xf32>
    %cst = arith.constant dense<0.000000e+00> : vector<64x32xf32>
    %6 = tpu.matmul %4, %5, %cst {dimension_numbers = #tpu.dot_dimension_numbers<[1], [0], [0], [1], [0, 0, 1, 1], [], []>} : vector<64x3xf32>, vector<3x32xf32>, vector<64x32xf32> -> vector<64x32xf32>
    %7 = vector.broadcast %0 : vector<1x32xf32> to vector<64x32xf32>
    %8 = arith.addf %6, %7 : vector<64x32xf32>
    %c0_7 = arith.constant 0 : index
    %c0_8 = arith.constant 0 : index
    %c0_9 = arith.constant 0 : index
    %9 = vector.load %arg8[%c0_7, %c0_8, %c0_9] : memref<11x32x32xf32, #tpu.memory_space<vmem>>, vector<1x32x32xf32>
    %10 = vector.shape_cast %9 : vector<1x32x32xf32> to vector<32x32xf32>
    %c1 = arith.constant 1 : index
    %c0_10 = arith.constant 0 : index
    %c0_11 = arith.constant 0 : index
    %11 = vector.load %arg8[%c1, %c0_10, %c0_11] : memref<11x32x32xf32, #tpu.memory_space<vmem>>, vector<1x32x32xf32>
    %12 = vector.shape_cast %11 : vector<1x32x32xf32> to vector<32x32xf32>
    %c2 = arith.constant 2 : index
    %c0_12 = arith.constant 0 : index
    %c0_13 = arith.constant 0 : index
    %13 = vector.load %arg8[%c2, %c0_12, %c0_13] : memref<11x32x32xf32, #tpu.memory_space<vmem>>, vector<1x32x32xf32>
    %14 = vector.shape_cast %13 : vector<1x32x32xf32> to vector<32x32xf32>
    %c3 = arith.constant 3 : index
    %c0_14 = arith.constant 0 : index
    %c0_15 = arith.constant 0 : index
    %15 = vector.load %arg8[%c3, %c0_14, %c0_15] : memref<11x32x32xf32, #tpu.memory_space<vmem>>, vector<1x32x32xf32>
    %16 = vector.shape_cast %15 : vector<1x32x32xf32> to vector<32x32xf32>
    %c4 = arith.constant 4 : index
    %c0_16 = arith.constant 0 : index
    %c0_17 = arith.constant 0 : index
    %17 = vector.load %arg8[%c4, %c0_16, %c0_17] : memref<11x32x32xf32, #tpu.memory_space<vmem>>, vector<1x32x32xf32>
    %18 = vector.shape_cast %17 : vector<1x32x32xf32> to vector<32x32xf32>
    %c0_18 = arith.constant 0 : index
    %c0_19 = arith.constant 0 : index
    %c0_20 = arith.constant 0 : index
    %19 = vector.load %arg7[%c0_18, %c0_19, %c0_20] : memref<2x32x64xf32, #tpu.memory_space<vmem>>, vector<1x32x64xf32>
    %20 = vector.shape_cast %19 : vector<1x32x64xf32> to vector<32x64xf32>
    %c0_21 = arith.constant 0 : index
    %c0_22 = arith.constant 0 : index
    %21 = vector.load %arg9[%c0_21, %c0_22] : memref<8x32xf32, #tpu.memory_space<vmem>>, vector<1x32xf32>
    %c1_23 = arith.constant 1 : index
    %c0_24 = arith.constant 0 : index
    %22 = vector.load %arg9[%c1_23, %c0_24] : memref<8x32xf32, #tpu.memory_space<vmem>>, vector<1x32xf32>
    %c2_25 = arith.constant 2 : index
    %c0_26 = arith.constant 0 : index
    %23 = vector.load %arg9[%c2_25, %c0_26] : memref<8x32xf32, #tpu.memory_space<vmem>>, vector<1x32xf32>
    %24 = vector.extract_strided_slice %8 {offsets = [0, 0], sizes = [32, 32], strides = [1, 1]} : vector<64x32xf32> to vector<32x32xf32>
    %c0_27 = arith.constant 0 : index
    %c0_28 = arith.constant 0 : index
    %c0_29 = arith.constant 0 : index
    %25 = vector.load %arg3[%c0_27, %c0_28, %c0_29] : memref<2x16x32xf32, #tpu.memory_space<vmem>>, vector<1x16x32xf32>
    %26 = vector.shape_cast %25 : vector<1x16x32xf32> to vector<16x32xf32>
    %cst_30 = arith.constant dense<0.000000e+00> : vector<16x32xf32>
    %27 = tpu.matmul %26, %24, %cst_30 {dimension_numbers = #tpu.dot_dimension_numbers<[1], [0], [0], [1], [0, 0, 1, 1], [], []>} : vector<16x32xf32>, vector<32x32xf32>, vector<16x32xf32> -> vector<16x32xf32>
    %c0_31 = arith.constant 0 : index
    %c0_32 = arith.constant 0 : index
    %c0_33 = arith.constant 0 : index
    %28 = vector.load %arg4[%c0_31, %c0_32, %c0_33] : memref<2x32x32xf32, #tpu.memory_space<vmem>>, vector<1x32x32xf32>
    %29 = vector.shape_cast %28 : vector<1x32x32xf32> to vector<32x32xf32>
    %30 = vector.extract_strided_slice %29 {offsets = [0, 0], sizes = [16, 32], strides = [1, 1]} : vector<32x32xf32> to vector<16x32xf32>
    %c0_34 = arith.constant 0 : index
    %c0_35 = arith.constant 0 : index
    %c0_36 = arith.constant 0 : index
    %31 = vector.load %arg2[%c0_34, %c0_35, %c0_36] : memref<2x32x16xf32, #tpu.memory_space<vmem>>, vector<1x32x16xf32>
    %32 = vector.shape_cast %31 : vector<1x32x16xf32> to vector<32x16xf32>
    %33 = arith.mulf %30, %27 : vector<16x32xf32>
    %cst_37 = arith.constant dense<0.000000e+00> : vector<32x32xf32>
    %34 = tpu.matmul %32, %33, %cst_37 {dimension_numbers = #tpu.dot_dimension_numbers<[1], [0], [0], [1], [0, 0, 1, 1], [], []>} : vector<32x16xf32>, vector<16x32xf32>, vector<32x32xf32> -> vector<32x32xf32>
    %c0_38 = arith.constant 0 : index
    %c0_39 = arith.constant 0 : index
    %c0_40 = arith.constant 0 : index
    %35 = vector.load %arg5[%c0_38, %c0_39, %c0_40] : memref<2x64x32xf32, #tpu.memory_space<vmem>>, vector<1x64x32xf32>
    %36 = vector.shape_cast %35 : vector<1x64x32xf32> to vector<64x32xf32>
    %cst_41 = arith.constant dense<0.000000e+00> : vector<64x32xf32>
    %37 = tpu.matmul %36, %34, %cst_41 {dimension_numbers = #tpu.dot_dimension_numbers<[1], [0], [0], [1], [0, 0, 1, 1], [], []>} : vector<64x32xf32>, vector<32x32xf32>, vector<64x32xf32> -> vector<64x32xf32>
    %38 = vector.extract_strided_slice %37 {offsets = [0, 0], sizes = [32, 32], strides = [1, 1]} : vector<64x32xf32> to vector<32x32xf32>
    %39 = vector.extract_strided_slice %37 {offsets = [32, 0], sizes = [32, 32], strides = [1, 1]} : vector<64x32xf32> to vector<32x32xf32>
    %40 = vector.extract_strided_slice %8 {offsets = [32, 0], sizes = [32, 32], strides = [1, 1]} : vector<64x32xf32> to vector<32x32xf32>
    %c1_42 = arith.constant 1 : index
    %c0_43 = arith.constant 0 : index
    %c0_44 = arith.constant 0 : index
    %41 = vector.load %arg3[%c1_42, %c0_43, %c0_44] : memref<2x16x32xf32, #tpu.memory_space<vmem>>, vector<1x16x32xf32>
    %42 = vector.shape_cast %41 : vector<1x16x32xf32> to vector<16x32xf32>
    %cst_45 = arith.constant dense<0.000000e+00> : vector<16x32xf32>
    %43 = tpu.matmul %42, %40, %cst_45 {dimension_numbers = #tpu.dot_dimension_numbers<[1], [0], [0], [1], [0, 0, 1, 1], [], []>} : vector<16x32xf32>, vector<32x32xf32>, vector<16x32xf32> -> vector<16x32xf32>
    %c1_46 = arith.constant 1 : index
    %c0_47 = arith.constant 0 : index
    %c0_48 = arith.constant 0 : index
    %44 = vector.load %arg4[%c1_46, %c0_47, %c0_48] : memref<2x32x32xf32, #tpu.memory_space<vmem>>, vector<1x32x32xf32>
    %45 = vector.shape_cast %44 : vector<1x32x32xf32> to vector<32x32xf32>
    %46 = vector.extract_strided_slice %45 {offsets = [0, 0], sizes = [16, 32], strides = [1, 1]} : vector<32x32xf32> to vector<16x32xf32>
    %c1_49 = arith.constant 1 : index
    %c0_50 = arith.constant 0 : index
    %c0_51 = arith.constant 0 : index
    %47 = vector.load %arg2[%c1_49, %c0_50, %c0_51] : memref<2x32x16xf32, #tpu.memory_space<vmem>>, vector<1x32x16xf32>
    %48 = vector.shape_cast %47 : vector<1x32x16xf32> to vector<32x16xf32>
    %49 = arith.mulf %46, %43 : vector<16x32xf32>
    %cst_52 = arith.constant dense<0.000000e+00> : vector<32x32xf32>
    %50 = tpu.matmul %48, %49, %cst_52 {dimension_numbers = #tpu.dot_dimension_numbers<[1], [0], [0], [1], [0, 0, 1, 1], [], []>} : vector<32x16xf32>, vector<16x32xf32>, vector<32x32xf32> -> vector<32x32xf32>
    %c1_53 = arith.constant 1 : index
    %c0_54 = arith.constant 0 : index
    %c0_55 = arith.constant 0 : index
    %51 = vector.load %arg5[%c1_53, %c0_54, %c0_55] : memref<2x64x32xf32, #tpu.memory_space<vmem>>, vector<1x64x32xf32>
    %52 = vector.shape_cast %51 : vector<1x64x32xf32> to vector<64x32xf32>
    %cst_56 = arith.constant dense<0.000000e+00> : vector<64x32xf32>
    %53 = tpu.matmul %52, %50, %cst_56 {dimension_numbers = #tpu.dot_dimension_numbers<[1], [0], [0], [1], [0, 0, 1, 1], [], []>} : vector<64x32xf32>, vector<32x32xf32>, vector<64x32xf32> -> vector<64x32xf32>
    %54 = vector.extract_strided_slice %53 {offsets = [0, 0], sizes = [32, 32], strides = [1, 1]} : vector<64x32xf32> to vector<32x32xf32>
    %55 = vector.extract_strided_slice %53 {offsets = [32, 0], sizes = [32, 32], strides = [1, 1]} : vector<64x32xf32> to vector<32x32xf32>
    %56 = tpu.concatenate %34, %50 in 0 : vector<32x32xf32>, vector<32x32xf32> -> vector<64x32xf32>
    %57 = tpu.concatenate %38, %54 in 0 : vector<32x32xf32>, vector<32x32xf32> -> vector<64x32xf32>
    %58 = tpu.concatenate %39, %55 in 0 : vector<32x32xf32>, vector<32x32xf32> -> vector<64x32xf32>
    %59 = tpu.concatenate %57, %58 in 0 : vector<64x32xf32>, vector<64x32xf32> -> vector<128x32xf32>
    %cst_57 = arith.constant dense<0.000000e+00> : vector<128x64xf32>
    %60 = tpu.matmul %59, %20, %cst_57 {dimension_numbers = #tpu.dot_dimension_numbers<[1], [0], [0], [1], [0, 0, 1, 1], [], []>} : vector<128x32xf32>, vector<32x64xf32>, vector<128x64xf32> -> vector<128x64xf32>
    %61 = vector.extract_strided_slice %60 {offsets = [0, 0], sizes = [64, 32], strides = [1, 1]} : vector<128x64xf32> to vector<64x32xf32>
    %62 = vector.extract_strided_slice %60 {offsets = [64, 32], sizes = [64, 32], strides = [1, 1]} : vector<128x64xf32> to vector<64x32xf32>
    %63 = arith.subf %61, %62 : vector<64x32xf32>
    %64 = arith.mulf %57, %63 : vector<64x32xf32>
    %65 = arith.addf %61, %62 : vector<64x32xf32>
    %66 = arith.mulf %58, %65 : vector<64x32xf32>
    %67 = arith.addf %64, %66 : vector<64x32xf32>
    %68 = math.tanh %67 : vector<64x32xf32>
    %cst_58 = arith.constant dense<0.000000e+00> : vector<64x32xf32>
    %69 = tpu.matmul %8, %10, %cst_58 {dimension_numbers = #tpu.dot_dimension_numbers<[1], [0], [0], [1], [0, 0, 1, 1], [], []>} : vector<64x32xf32>, vector<32x32xf32>, vector<64x32xf32> -> vector<64x32xf32>
    %cst_59 = arith.constant dense<0.000000e+00> : vector<64x32xf32>
    %70 = tpu.matmul %56, %12, %cst_59 {dimension_numbers = #tpu.dot_dimension_numbers<[1], [0], [0], [1], [0, 0, 1, 1], [], []>} : vector<64x32xf32>, vector<32x32xf32>, vector<64x32xf32> -> vector<64x32xf32>
    %71 = arith.addf %69, %70 : vector<64x32xf32>
    %cst_60 = arith.constant dense<0.000000e+00> : vector<64x32xf32>
    %72 = tpu.matmul %68, %14, %cst_60 {dimension_numbers = #tpu.dot_dimension_numbers<[1], [0], [0], [1], [0, 0, 1, 1], [], []>} : vector<64x32xf32>, vector<32x32xf32>, vector<64x32xf32> -> vector<64x32xf32>
    %73 = arith.addf %71, %72 : vector<64x32xf32>
    %74 = vector.broadcast %21 : vector<1x32xf32> to vector<64x32xf32>
    %75 = arith.addf %73, %74 : vector<64x32xf32>
    %cst_61 = arith.constant 0.000000e+00 : f32
    %76 = vector.broadcast %cst_61 : f32 to vector<64x32xf32>
    %77 = arith.maximumf %75, %76 : vector<64x32xf32>
    %cst_62 = arith.constant dense<0.000000e+00> : vector<64x32xf32>
    %78 = tpu.matmul %77, %16, %cst_62 {dimension_numbers = #tpu.dot_dimension_numbers<[1], [0], [0], [1], [0, 0, 1, 1], [], []>} : vector<64x32xf32>, vector<32x32xf32>, vector<64x32xf32> -> vector<64x32xf32>
    %79 = vector.broadcast %22 : vector<1x32xf32> to vector<64x32xf32>
    %80 = arith.addf %78, %79 : vector<64x32xf32>
    %cst_63 = arith.constant 0.000000e+00 : f32
    %81 = vector.broadcast %cst_63 : f32 to vector<64x32xf32>
    %82 = arith.maximumf %80, %81 : vector<64x32xf32>
    %cst_64 = arith.constant dense<0.000000e+00> : vector<64x32xf32>
    %83 = tpu.matmul %82, %18, %cst_64 {dimension_numbers = #tpu.dot_dimension_numbers<[1], [0], [0], [1], [0, 0, 1, 1], [], []>} : vector<64x32xf32>, vector<32x32xf32>, vector<64x32xf32> -> vector<64x32xf32>
    %84 = arith.addf %8, %83 : vector<64x32xf32>
    %85 = vector.broadcast %23 : vector<1x32xf32> to vector<64x32xf32>
    %86 = arith.addf %84, %85 : vector<64x32xf32>
    %c5 = arith.constant 5 : index
    %c0_65 = arith.constant 0 : index
    %c0_66 = arith.constant 0 : index
    %87 = vector.load %arg8[%c5, %c0_65, %c0_66] : memref<11x32x32xf32, #tpu.memory_space<vmem>>, vector<1x32x32xf32>
    %88 = vector.shape_cast %87 : vector<1x32x32xf32> to vector<32x32xf32>
    %c6_67 = arith.constant 6 : index
    %c0_68 = arith.constant 0 : index
    %c0_69 = arith.constant 0 : index
    %89 = vector.load %arg8[%c6_67, %c0_68, %c0_69] : memref<11x32x32xf32, #tpu.memory_space<vmem>>, vector<1x32x32xf32>
    %90 = vector.shape_cast %89 : vector<1x32x32xf32> to vector<32x32xf32>
    %c7_70 = arith.constant 7 : index
    %c0_71 = arith.constant 0 : index
    %c0_72 = arith.constant 0 : index
    %91 = vector.load %arg8[%c7_70, %c0_71, %c0_72] : memref<11x32x32xf32, #tpu.memory_space<vmem>>, vector<1x32x32xf32>
    %92 = vector.shape_cast %91 : vector<1x32x32xf32> to vector<32x32xf32>
    %c8 = arith.constant 8 : index
    %c0_73 = arith.constant 0 : index
    %c0_74 = arith.constant 0 : index
    %93 = vector.load %arg8[%c8, %c0_73, %c0_74] : memref<11x32x32xf32, #tpu.memory_space<vmem>>, vector<1x32x32xf32>
    %94 = vector.shape_cast %93 : vector<1x32x32xf32> to vector<32x32xf32>
    %c9 = arith.constant 9 : index
    %c0_75 = arith.constant 0 : index
    %c0_76 = arith.constant 0 : index
    %95 = vector.load %arg8[%c9, %c0_75, %c0_76] : memref<11x32x32xf32, #tpu.memory_space<vmem>>, vector<1x32x32xf32>
    %96 = vector.shape_cast %95 : vector<1x32x32xf32> to vector<32x32xf32>
    %c1_77 = arith.constant 1 : index
    %c0_78 = arith.constant 0 : index
    %c0_79 = arith.constant 0 : index
    %97 = vector.load %arg7[%c1_77, %c0_78, %c0_79] : memref<2x32x64xf32, #tpu.memory_space<vmem>>, vector<1x32x64xf32>
    %98 = vector.shape_cast %97 : vector<1x32x64xf32> to vector<32x64xf32>
    %c3_80 = arith.constant 3 : index
    %c0_81 = arith.constant 0 : index
    %99 = vector.load %arg9[%c3_80, %c0_81] : memref<8x32xf32, #tpu.memory_space<vmem>>, vector<1x32xf32>
    %c4_82 = arith.constant 4 : index
    %c0_83 = arith.constant 0 : index
    %100 = vector.load %arg9[%c4_82, %c0_83] : memref<8x32xf32, #tpu.memory_space<vmem>>, vector<1x32xf32>
    %c5_84 = arith.constant 5 : index
    %c0_85 = arith.constant 0 : index
    %101 = vector.load %arg9[%c5_84, %c0_85] : memref<8x32xf32, #tpu.memory_space<vmem>>, vector<1x32xf32>
    %102 = vector.extract_strided_slice %86 {offsets = [0, 0], sizes = [32, 32], strides = [1, 1]} : vector<64x32xf32> to vector<32x32xf32>
    %c0_86 = arith.constant 0 : index
    %c0_87 = arith.constant 0 : index
    %c0_88 = arith.constant 0 : index
    %103 = vector.load %arg3[%c0_86, %c0_87, %c0_88] : memref<2x16x32xf32, #tpu.memory_space<vmem>>, vector<1x16x32xf32>
    %104 = vector.shape_cast %103 : vector<1x16x32xf32> to vector<16x32xf32>
    %cst_89 = arith.constant dense<0.000000e+00> : vector<16x32xf32>
    %105 = tpu.matmul %104, %102, %cst_89 {dimension_numbers = #tpu.dot_dimension_numbers<[1], [0], [0], [1], [0, 0, 1, 1], [], []>} : vector<16x32xf32>, vector<32x32xf32>, vector<16x32xf32> -> vector<16x32xf32>
    %c0_90 = arith.constant 0 : index
    %c0_91 = arith.constant 0 : index
    %c0_92 = arith.constant 0 : index
    %106 = vector.load %arg4[%c0_90, %c0_91, %c0_92] : memref<2x32x32xf32, #tpu.memory_space<vmem>>, vector<1x32x32xf32>
    %107 = vector.shape_cast %106 : vector<1x32x32xf32> to vector<32x32xf32>
    %108 = vector.extract_strided_slice %107 {offsets = [16, 0], sizes = [16, 32], strides = [1, 1]} : vector<32x32xf32> to vector<16x32xf32>
    %c0_93 = arith.constant 0 : index
    %c0_94 = arith.constant 0 : index
    %c0_95 = arith.constant 0 : index
    %109 = vector.load %arg2[%c0_93, %c0_94, %c0_95] : memref<2x32x16xf32, #tpu.memory_space<vmem>>, vector<1x32x16xf32>
    %110 = vector.shape_cast %109 : vector<1x32x16xf32> to vector<32x16xf32>
    %111 = arith.mulf %108, %105 : vector<16x32xf32>
    %cst_96 = arith.constant dense<0.000000e+00> : vector<32x32xf32>
    %112 = tpu.matmul %110, %111, %cst_96 {dimension_numbers = #tpu.dot_dimension_numbers<[1], [0], [0], [1], [0, 0, 1, 1], [], []>} : vector<32x16xf32>, vector<16x32xf32>, vector<32x32xf32> -> vector<32x32xf32>
    %c0_97 = arith.constant 0 : index
    %c0_98 = arith.constant 0 : index
    %c0_99 = arith.constant 0 : index
    %113 = vector.load %arg5[%c0_97, %c0_98, %c0_99] : memref<2x64x32xf32, #tpu.memory_space<vmem>>, vector<1x64x32xf32>
    %114 = vector.shape_cast %113 : vector<1x64x32xf32> to vector<64x32xf32>
    %cst_100 = arith.constant dense<0.000000e+00> : vector<64x32xf32>
    %115 = tpu.matmul %114, %112, %cst_100 {dimension_numbers = #tpu.dot_dimension_numbers<[1], [0], [0], [1], [0, 0, 1, 1], [], []>} : vector<64x32xf32>, vector<32x32xf32>, vector<64x32xf32> -> vector<64x32xf32>
    %116 = vector.extract_strided_slice %115 {offsets = [0, 0], sizes = [32, 32], strides = [1, 1]} : vector<64x32xf32> to vector<32x32xf32>
    %117 = vector.extract_strided_slice %115 {offsets = [32, 0], sizes = [32, 32], strides = [1, 1]} : vector<64x32xf32> to vector<32x32xf32>
    %118 = vector.extract_strided_slice %86 {offsets = [32, 0], sizes = [32, 32], strides = [1, 1]} : vector<64x32xf32> to vector<32x32xf32>
    %c1_101 = arith.constant 1 : index
    %c0_102 = arith.constant 0 : index
    %c0_103 = arith.constant 0 : index
    %119 = vector.load %arg3[%c1_101, %c0_102, %c0_103] : memref<2x16x32xf32, #tpu.memory_space<vmem>>, vector<1x16x32xf32>
    %120 = vector.shape_cast %119 : vector<1x16x32xf32> to vector<16x32xf32>
    %cst_104 = arith.constant dense<0.000000e+00> : vector<16x32xf32>
    %121 = tpu.matmul %120, %118, %cst_104 {dimension_numbers = #tpu.dot_dimension_numbers<[1], [0], [0], [1], [0, 0, 1, 1], [], []>} : vector<16x32xf32>, vector<32x32xf32>, vector<16x32xf32> -> vector<16x32xf32>
    %c1_105 = arith.constant 1 : index
    %c0_106 = arith.constant 0 : index
    %c0_107 = arith.constant 0 : index
    %122 = vector.load %arg4[%c1_105, %c0_106, %c0_107] : memref<2x32x32xf32, #tpu.memory_space<vmem>>, vector<1x32x32xf32>
    %123 = vector.shape_cast %122 : vector<1x32x32xf32> to vector<32x32xf32>
    %124 = vector.extract_strided_slice %123 {offsets = [16, 0], sizes = [16, 32], strides = [1, 1]} : vector<32x32xf32> to vector<16x32xf32>
    %c1_108 = arith.constant 1 : index
    %c0_109 = arith.constant 0 : index
    %c0_110 = arith.constant 0 : index
    %125 = vector.load %arg2[%c1_108, %c0_109, %c0_110] : memref<2x32x16xf32, #tpu.memory_space<vmem>>, vector<1x32x16xf32>
    %126 = vector.shape_cast %125 : vector<1x32x16xf32> to vector<32x16xf32>
    %127 = arith.mulf %124, %121 : vector<16x32xf32>
    %cst_111 = arith.constant dense<0.000000e+00> : vector<32x32xf32>
    %128 = tpu.matmul %126, %127, %cst_111 {dimension_numbers = #tpu.dot_dimension_numbers<[1], [0], [0], [1], [0, 0, 1, 1], [], []>} : vector<32x16xf32>, vector<16x32xf32>, vector<32x32xf32> -> vector<32x32xf32>
    %c1_112 = arith.constant 1 : index
    %c0_113 = arith.constant 0 : index
    %c0_114 = arith.constant 0 : index
    %129 = vector.load %arg5[%c1_112, %c0_113, %c0_114] : memref<2x64x32xf32, #tpu.memory_space<vmem>>, vector<1x64x32xf32>
    %130 = vector.shape_cast %129 : vector<1x64x32xf32> to vector<64x32xf32>
    %cst_115 = arith.constant dense<0.000000e+00> : vector<64x32xf32>
    %131 = tpu.matmul %130, %128, %cst_115 {dimension_numbers = #tpu.dot_dimension_numbers<[1], [0], [0], [1], [0, 0, 1, 1], [], []>} : vector<64x32xf32>, vector<32x32xf32>, vector<64x32xf32> -> vector<64x32xf32>
    %132 = vector.extract_strided_slice %131 {offsets = [0, 0], sizes = [32, 32], strides = [1, 1]} : vector<64x32xf32> to vector<32x32xf32>
    %133 = vector.extract_strided_slice %131 {offsets = [32, 0], sizes = [32, 32], strides = [1, 1]} : vector<64x32xf32> to vector<32x32xf32>
    %134 = tpu.concatenate %112, %128 in 0 : vector<32x32xf32>, vector<32x32xf32> -> vector<64x32xf32>
    %135 = tpu.concatenate %116, %132 in 0 : vector<32x32xf32>, vector<32x32xf32> -> vector<64x32xf32>
    %136 = tpu.concatenate %117, %133 in 0 : vector<32x32xf32>, vector<32x32xf32> -> vector<64x32xf32>
    %137 = tpu.concatenate %135, %136 in 0 : vector<64x32xf32>, vector<64x32xf32> -> vector<128x32xf32>
    %cst_116 = arith.constant dense<0.000000e+00> : vector<128x64xf32>
    %138 = tpu.matmul %137, %98, %cst_116 {dimension_numbers = #tpu.dot_dimension_numbers<[1], [0], [0], [1], [0, 0, 1, 1], [], []>} : vector<128x32xf32>, vector<32x64xf32>, vector<128x64xf32> -> vector<128x64xf32>
    %139 = vector.extract_strided_slice %138 {offsets = [0, 0], sizes = [64, 32], strides = [1, 1]} : vector<128x64xf32> to vector<64x32xf32>
    %140 = vector.extract_strided_slice %138 {offsets = [64, 32], sizes = [64, 32], strides = [1, 1]} : vector<128x64xf32> to vector<64x32xf32>
    %141 = arith.subf %139, %140 : vector<64x32xf32>
    %142 = arith.mulf %135, %141 : vector<64x32xf32>
    %143 = arith.addf %139, %140 : vector<64x32xf32>
    %144 = arith.mulf %136, %143 : vector<64x32xf32>
    %145 = arith.addf %142, %144 : vector<64x32xf32>
    %146 = math.tanh %145 : vector<64x32xf32>
    %cst_117 = arith.constant dense<0.000000e+00> : vector<64x32xf32>
    %147 = tpu.matmul %86, %88, %cst_117 {dimension_numbers = #tpu.dot_dimension_numbers<[1], [0], [0], [1], [0, 0, 1, 1], [], []>} : vector<64x32xf32>, vector<32x32xf32>, vector<64x32xf32> -> vector<64x32xf32>
    %cst_118 = arith.constant dense<0.000000e+00> : vector<64x32xf32>
    %148 = tpu.matmul %134, %90, %cst_118 {dimension_numbers = #tpu.dot_dimension_numbers<[1], [0], [0], [1], [0, 0, 1, 1], [], []>} : vector<64x32xf32>, vector<32x32xf32>, vector<64x32xf32> -> vector<64x32xf32>
    %149 = arith.addf %147, %148 : vector<64x32xf32>
    %cst_119 = arith.constant dense<0.000000e+00> : vector<64x32xf32>
    %150 = tpu.matmul %146, %92, %cst_119 {dimension_numbers = #tpu.dot_dimension_numbers<[1], [0], [0], [1], [0, 0, 1, 1], [], []>} : vector<64x32xf32>, vector<32x32xf32>, vector<64x32xf32> -> vector<64x32xf32>
    %151 = arith.addf %149, %150 : vector<64x32xf32>
    %152 = vector.broadcast %99 : vector<1x32xf32> to vector<64x32xf32>
    %153 = arith.addf %151, %152 : vector<64x32xf32>
    %cst_120 = arith.constant 0.000000e+00 : f32
    %154 = vector.broadcast %cst_120 : f32 to vector<64x32xf32>
    %155 = arith.maximumf %153, %154 : vector<64x32xf32>
    %cst_121 = arith.constant dense<0.000000e+00> : vector<64x32xf32>
    %156 = tpu.matmul %155, %94, %cst_121 {dimension_numbers = #tpu.dot_dimension_numbers<[1], [0], [0], [1], [0, 0, 1, 1], [], []>} : vector<64x32xf32>, vector<32x32xf32>, vector<64x32xf32> -> vector<64x32xf32>
    %157 = vector.broadcast %100 : vector<1x32xf32> to vector<64x32xf32>
    %158 = arith.addf %156, %157 : vector<64x32xf32>
    %cst_122 = arith.constant 0.000000e+00 : f32
    %159 = vector.broadcast %cst_122 : f32 to vector<64x32xf32>
    %160 = arith.maximumf %158, %159 : vector<64x32xf32>
    %cst_123 = arith.constant dense<0.000000e+00> : vector<64x32xf32>
    %161 = tpu.matmul %160, %96, %cst_123 {dimension_numbers = #tpu.dot_dimension_numbers<[1], [0], [0], [1], [0, 0, 1, 1], [], []>} : vector<64x32xf32>, vector<32x32xf32>, vector<64x32xf32> -> vector<64x32xf32>
    %162 = arith.addf %86, %161 : vector<64x32xf32>
    %163 = vector.broadcast %101 : vector<1x32xf32> to vector<64x32xf32>
    %164 = arith.addf %162, %163 : vector<64x32xf32>
    %cst_124 = arith.constant dense<0.000000e+00> : vector<64x32xf32>
    %165 = tpu.matmul %164, %3, %cst_124 {dimension_numbers = #tpu.dot_dimension_numbers<[1], [0], [0], [1], [0, 0, 1, 1], [], []>} : vector<64x32xf32>, vector<32x32xf32>, vector<64x32xf32> -> vector<64x32xf32>
    %166 = vector.broadcast %1 : vector<1x32xf32> to vector<64x32xf32>
    %167 = arith.addf %165, %166 : vector<64x32xf32>
    %c0_125 = arith.constant 0 : index
    %c0_126 = arith.constant 0 : index
    %168 = vector.load %arg10[%c0_125, %c0_126] : memref<64x32xf32, #tpu.memory_space<vmem>>, vector<64x32xf32>
    tpu.vector_store %arg10[%c0_125, %c0_126], %167 {strides = array<i32>} : memref<64x32xf32, #tpu.memory_space<vmem>>, vector<64x32xf32>,
    return
  }
  func.func @transform_0(%arg0: i32) -> (i32, i32) {
    %c0_i32 = arith.constant 0 : i32
    %c0_i32_0 = arith.constant 0 : i32
    return %arg0, %c0_i32 : i32, i32
  }
  func.func @transform_1(%arg0: i32) -> (i32, i32, i32) {
    %c0_i32 = arith.constant 0 : i32
    %c0_i32_0 = arith.constant 0 : i32
    %c0_i32_1 = arith.constant 0 : i32
    return %arg0, %c0_i32, %c0_i32_0 : i32, i32, i32
  }
  func.func @transform_2(%arg0: i32) -> (i32, i32, i32) {
    %c0_i32 = arith.constant 0 : i32
    %c0_i32_0 = arith.constant 0 : i32
    %c0_i32_1 = arith.constant 0 : i32
    return %arg0, %c0_i32, %c0_i32_0 : i32, i32, i32
  }
  func.func @transform_3(%arg0: i32) -> (i32, i32, i32) {
    %c0_i32 = arith.constant 0 : i32
    %c0_i32_0 = arith.constant 0 : i32
    %c0_i32_1 = arith.constant 0 : i32
    return %arg0, %c0_i32, %c0_i32_0 : i32, i32, i32
  }
  func.func @transform_4(%arg0: i32) -> (i32, i32, i32) {
    %c0_i32 = arith.constant 0 : i32
    %c0_i32_0 = arith.constant 0 : i32
    %c0_i32_1 = arith.constant 0 : i32
    return %arg0, %c0_i32, %c0_i32_0 : i32, i32, i32
  }
  func.func @transform_5(%arg0: i32) -> (i32, i32) {
    %c0_i32 = arith.constant 0 : i32
    %c0_i32_0 = arith.constant 0 : i32
    %c0_i32_1 = arith.constant 0 : i32
    return %c0_i32, %c0_i32_0 : i32, i32
  }
  func.func @transform_6(%arg0: i32) -> (i32, i32, i32) {
    %c0_i32 = arith.constant 0 : i32
    %c0_i32_0 = arith.constant 0 : i32
    %c0_i32_1 = arith.constant 0 : i32
    %c0_i32_2 = arith.constant 0 : i32
    return %c0_i32, %c0_i32_0, %c0_i32_1 : i32, i32, i32
  }
  func.func @transform_7(%arg0: i32) -> (i32, i32, i32) {
    %c0_i32 = arith.constant 0 : i32
    %c0_i32_0 = arith.constant 0 : i32
    %c0_i32_1 = arith.constant 0 : i32
    %c0_i32_2 = arith.constant 0 : i32
    return %c0_i32, %c0_i32_0, %c0_i32_1 : i32, i32, i32
  }
  func.func @transform_8(%arg0: i32) -> (i32, i32) {
    %c0_i32 = arith.constant 0 : i32
    %c0_i32_0 = arith.constant 0 : i32
    %c0_i32_1 = arith.constant 0 : i32
    return %c0_i32, %c0_i32_0 : i32, i32
  }
  func.func @transform_9(%arg0: i32) -> (i32, i32) {
    %c0_i32 = arith.constant 0 : i32
    %c0_i32_0 = arith.constant 0 : i32
    return %arg0, %c0_i32 : i32, i32
  }
}

</mosaic_0001>

<bundles_post_ra>
// kernel: tpu_custom_call.1
= control target key start
LH: loop header
LB: loop body
LE: loop exit
PB: predicated region body
PF: predicated region fallthrough
CT: control target
= control target key end

     0   :  { %14 = vsyncpa [#allocation3], 0  ;;  %s2200_s12 = smov [#allocation2]   ;;  %s2201_s14 = smov 128   ;;  %s3008_s0 = inlined_call_operand.vmem [shape: f32[64,3], index: 0, kind: input, shape index: {}]   ;;  %s3009_s1 = inlined_call_operand.vmem [shape: f32[2,32,16], index: 1, kind: input, shape index: {}]   ;;  %s3010_s2 = inlined_call_operand.vmem [shape: f32[2,16,32], index: 2, kind: input, shape index: {}]   ;;  %s3011_s3 = inlined_call_operand.vmem [shape: f32[2,32,32], index: 3, kind: input, shape index: {}]   ;;  %s3012_s4 = inlined_call_operand.vmem [shape: f32[2,64,32], index: 4, kind: input, shape index: {}]   ;;  %s3013_s5 = inlined_call_operand.vmem [shape: f32[3,32], index: 5, kind: input, shape index: {}]   ;;  %s3014_s6 = inlined_call_operand.vmem [shape: f32[2,32,64], index: 6, kind: input, shape index: {}]   ;;  %s3015_s7 = inlined_call_operand.hbm [shape: f32[11,32,32], index: 7, kind: input, shape index: {}]   ;;  %s3016_s8 = inlined_call_operand.vmem [shape: f32[8,32], index: 8, kind: input, shape index: {}]   ;;  %s3017_s9 = inlined_call_operand.vmem [shape: f32[64,32], index: 9, kind: output, shape index: {}]  }
   0x1   :  { %s33_s11 = sshll.u32 %s3015_s7, 4  ;;  %s35_s13 = sshll.u32 %s2200_s12, 4  ;;  %s34_s11 = int_to_ptr.hbm [resolvable:$true] %s33_s11  ;;  %s36_s13 = int_to_ptr.vmem [resolvable:$true] %s35_s13 }
   0x2   :  { %s2202_s15 = smov 8  }
   0x3   :  { %41 = dma.hbm_to_vmem [thread:$0]  %s34_s11, 5632, %s36_s13, [#allocation3], %s2201_s14, %s2201_s14, %s2202_s15  }
   0x4   :  { %2198 = dma.done.wait [#allocation3], 5632  }
   0x5   :  { %2199 = vsyncadd [#allocation3], 4294961664  ;;  %vm90_vm0 = vcmask 1042432   ;;  %vm65_vm1 = vcmask 23552   ;;  %v63_v0 = vld [vmem:[%s3013_s5] sm:$0x7] }
   0x6   :  { %v55_v1 = vld [vmem:[%s3008_s0] sm:$0xff]  ;;  %1922 = vmatpush.msk.msra.mxu0 %vm90_vm0, %v63_v0  ;;  %2129 = vmatpush.msk.msra.mxu3 %vm90_vm0, %v63_v0  ;;  %v56_v2 = vld [vmem:[%s3008_s0 + $0x8] sm:$0xff]  ;;  %v57_v3 = vld [vmem:[%s3008_s0 + $0x10] sm:$0xff]  ;;  %vm168_vm2 = vcmask 261120   ;;  %vm208_vm3 = vcmask 130048  }
   0x7   :  { %1923 = vmatmul.msk.f32.vlgmr.msra.gmra.mxu0 %vm65_vm1, %v55_v1  ;;  %v58_v4 = vld [vmem:[%s3008_s0 + $0x18] sm:$0xff]  ;;  %v59_v6 = vld [vmem:[%s3008_s0 + $0x20] sm:$0xff]  ;;  %v60_v8 = vld [vmem:[%s3008_s0 + $0x28] sm:$0xff] }
   0x8   :  { %v62_v9 = vld [vmem:[%s3008_s0 + $0x38] sm:$0xff]  ;;  %v61_v11 = vld [vmem:[%s3008_s0 + $0x30] sm:$0xff]  ;;  %v2134_v12 = vld [vmem:[%s3016_s8 + $0x6] ss:$0 sm:$0xff] }
   0x9   :  { %1930 = vmatmul.msk.f32.vlgmr.msra.gmra.mxu3 %vm65_vm1, %v62_v9  ;;  %v2309_v18 = vld [vmem:[%s3010_s2] sm:$0xff]  ;;  %v2317_v19 = vld [vmem:[%s3010_s2 + $0x8] sm:$0xff]  ;;  %v2356_v36 = vld [vmem:[%s3009_s1 + $0x10] sm:$0xff] }
   0xa   :  { %v199_v23 = vld [vmem:[%s3011_s3 + $0x8] sm:$0xff]  ;;  %v198_v25 = vld [vmem:[%s3011_s3] sm:$0xff]  ;;  %v2363_v37 = vld [vmem:[%s3009_s1 + $0x18] sm:$0xff] }
   0xb   :  { %v2330_v30 = vld [vmem:[%s3009_s1] sm:$0xff]  ;;  %v2347_v35 = vld [vmem:[%s3009_s1 + $0x8] sm:$0xff]  ;;  %v2370_v38 = vld [vmem:[%s3010_s2 + $0x10] sm:$0xff] }
   0xc   :  { %v2377_v39 = vld [vmem:[%s3010_s2 + $0x18] sm:$0xff]  ;;  %v2384_v44 = vld [vmem:[%s3012_s4] sm:$0xff]  ;;  %v2391_v46 = vld [vmem:[%s3012_s4 + $0x8] sm:$0xff] }
   0xd   :  { %v1950_v47 = vld [vmem:[%s3011_s3 + $0x28] sm:$0xff]  ;;  %v1949_v49 = vld [vmem:[%s3011_s3 + $0x20] sm:$0xff]  ;;  %v143_v53 = vld [vmem:[#allocation2 + $0x38] sm:$0xff] }
   0xe   :  { %v2404_v52 = vld [vmem:[%s3009_s1 + $0x20] sm:$0xff]  ;;  %v2409_v54 = vld [vmem:[%s3012_s4 + $0x10] sm:$0xff]  ;;  %v141_v56 = vld [vmem:[#allocation2 + $0x28] sm:$0xff] }
   0xf   :  { %1924 = vmatmul.msk.f32.gmra.mxu0 %vm65_vm1, %v56_v2  ;;  %v142_v55 = vld [vmem:[#allocation2 + $0x30] sm:$0xff]  ;;  %v140_v57 = vld [vmem:[#allocation2 + $0x20] sm:$0xff]  ;;  %v2418_v58 = vld [vmem:[%s3009_s1 + $0x28] sm:$0xff] }
  0x10   :  { %v2423_v59 = vld [vmem:[%s3012_s4 + $0x18] sm:$0xff]  ;;  %v137_v61 = vld [vmem:[#allocation2 + $0x10] sm:$0xff]  ;;  %v136_v62 = vld [vmem:[#allocation2 + $0x8] sm:$0xff] }
  0x11   :  { %v138_v60 = vld [vmem:[#allocation2 + $0x18] sm:$0xff]  ;;  %v2432_v63 = vld [vmem:[%s3009_s1 + $0x30] sm:$0xff]  ;;  %v2437_v0 = vld [vmem:[%s3012_s4 + $0x20] sm:$0xff] }
  0x12   :  { %3030 = vst [vmem:[#allocation5_spill] sm:$0xff] %v2437_v0  ;;  %v135_v1 = vld [vmem:[#allocation2] sm:$0xff]  ;;  %v2446_v2 = vld [vmem:[%s3009_s1 + $0x38] sm:$0xff] }
  0x17   :  { %1925 = vmatmul.msk.f32.gmra.mxu0 %vm65_vm1, %v57_v3  ;;  %v2451_v3 = vld [vmem:[%s3012_s4 + $0x28] sm:$0xff] }
  0x18   :  { %3031 = vst [vmem:[#allocation6_spill] sm:$0xff] %v2451_v3 }
  0x1f   :  { %1926 = vmatmul.msk.f32.gmra.mxu0 %vm65_vm1, %v58_v4  ;;  %v2460_v4 = vld [vmem:[%s3012_s4 + $0x30] sm:$0xff] }
  0x20   :  { %3032 = vst [vmem:[#allocation7_spill] sm:$0xff] %v2460_v4 }
  0x27   :  { %1927 = vmatmul.msk.f32.gmra.mxu0 %vm65_vm1, %v59_v6 }
  0x2f   :  { %1928 = vmatmul.msk.f32.gmra.mxu0 %vm65_vm1, %v60_v8 }
  0x37   :  { %1929 = vmatmul.msk.f32.gmra.mxu0 %vm65_vm1, %v61_v11  ;;  %v2505_v11 = vld [vmem:[%s3012_s4 + $0x48] sm:$0xff] }
  0x38   :  { %3035 = vst [vmem:[#allocation10_spill] sm:$0xff] %v2505_v11 }
  0x84   :  { %v111_v5 = vpop.f32.mrf.mxu0 }
  0x85   :  { %v2303_v17 = vadd.f32 %v2134_v12, %v111_v5  ;;  %v2468_v5 = vld [vmem:[%s3012_s4 + $0x38] sm:$0xff] }
  0x86   :  { %3033 = vst [vmem:[#allocation8_spill] sm:$0xff] %v2468_v5 }
  0x8c   :  { %v114_v7 = vpop.f32.mrf.mxu0  ;;  %v132_v26 = vpop.f32.mrf.mxu3 }
  0x8d   :  { %v2300_v16 = vadd.f32 %v2134_v12, %v114_v7  ;;  %v2332_v31 = vadd.f32 %v2134_v12, %v132_v26  ;;  %v2551_v26 = vld [vmem:[%s3012_s4 + $0x70] sm:$0xff] }
  0x8e   :  { %3040 = vst [vmem:[#allocation15_spill] sm:$0xff] %v2551_v26 }
  0x94   :  { %v117_v10 = vpop.f32.mrf.mxu0 }
  0x95   :  { %v2297_v15 = vadd.f32 %v2134_v12, %v117_v10  ;;  %v2498_v10 = vld [vmem:[%s3012_s4 + $0x40] sm:$0xff] }
  0x96   :  { %3034 = vst [vmem:[#allocation9_spill] sm:$0xff] %v2498_v10 }
  0x9c   :  { %v120_v13 = vpop.f32.mrf.mxu0 }
  0x9d   :  { %v2295_v14 = vadd.f32 %v2134_v12, %v120_v13  ;;  %v2519_v13 = vld [vmem:[%s3012_s4 + $0x58] sm:$0xff] }
  0x9e   :  { %3037 = vst [vmem:[#allocation12_spill] sm:$0xff] %v2519_v13 }
  0x9f   :  { %187 = vmatpush.msra.mxu1 %v2295_v14 }
  0xa1   :  { %188 = vmatpush.msra.mxu1 %v2297_v15 }
  0xa3   :  { %189 = vmatpush.msra.mxu1 %v2300_v16 }
  0xa4   :  { %v123_v20 = vpop.f32.mrf.mxu0 }
  0xa5   :  { %190 = vmatpush.msra.mxu1 %v2303_v17  ;;  %v2341_v34 = vadd.f32 %v2134_v12, %v123_v20  ;;  %v2526_v20 = vld [vmem:[%s3012_s4 + $0x60] sm:$0xff] }
  0xa6   :  { %1931 = vmatmul.msk.f32.vlgmr.msra.gmra.mxu1 %vm168_vm2, %v2309_v18  ;;  %3038 = vst [vmem:[#allocation13_spill] sm:$0xff] %v2526_v20 }
  0xac   :  { %v126_v22 = vpop.f32.mrf.mxu0 }
  0xad   :  { %v2338_v33 = vadd.f32 %v2134_v12, %v126_v22  ;;  %v162_v22 = vld [vmem:[%s3014_s6 + $0x18] sm:$0xff] }
  0xae   :  { %1932 = vmatmul.msk.f32.gmra.mxu1 %vm168_vm2, %v2317_v19  ;;  %542 = vmatpush.msrb.mxu0 %v162_v22 }
  0xb4   :  { %v129_v28 = vpop.f32.mrf.mxu0 }
  0xb5   :  { %v2334_v32 = vadd.f32 %v2134_v12, %v129_v28  ;;  %v2512_v12 = vld [vmem:[%s3012_s4 + $0x50] sm:$0xff] }
  0xb6   :  { %3036 = vst [vmem:[#allocation11_spill] sm:$0xff] %v2512_v12 }
 0x123   :  { %v192_v21 = vpop.f32.mrf.mxu1 }
 0x124   :  { %v206_v29 = vmul.f32 %v198_v25, %v192_v21  ;;  %v2533_v21 = vld [vmem:[%s3012_s4 + $0x68] sm:$0xff] }
 0x125   :  { %3039 = vst [vmem:[#allocation14_spill] sm:$0xff] %v2533_v21  ;;  %v160_v25 = vld [vmem:[%s3014_s6 + $0x8] sm:$0xff] }
 0x12b   :  { %v195_v24 = vpop.f32.mrf.mxu1 }
 0x12c   :  { %v207_v27 = vmul.f32 %v199_v23, %v195_v24  ;;  %v161_v24 = vld [vmem:[%s3014_s6 + $0x10] sm:$0xff] }
 0x12d   :  { %543 = vmatpush.msrb.mxu0 %v161_v24 }
 0x12e   :  { %235 = vmatpush.msrb.mxu1 %v207_v27  ;;  %v159_v27 = vld [vmem:[%s3014_s6] sm:$0xff] }
 0x12f   :  { %544 = vmatpush.msrb.mxu0 %v160_v25 }
 0x130   :  { %236 = vmatpush.msrb.mxu1 %v206_v29  ;;  %v2565_v29 = vld [vmem:[%s3012_s4 + $0x78] sm:$0xff]  ;;  %s2203_s4 = smov 96  }
 0x131   :  { %1933 = vmatmul.msk.f32.vlgmr.msrb.gmra.mxu1 %vm208_vm3, %v2330_v30  ;;  %545 = vmatpush.msrb.mxu0 %v159_v27  ;;  %3041 = vst [vmem:[#allocation16_spill] sm:$0xff] %v2565_v29 }
 0x132   :  { %344 = vmatpush.msra.mxu1 %v2332_v31 }
 0x134   :  { %345 = vmatpush.msra.mxu1 %v2334_v32 }
 0x136   :  { %346 = vmatpush.msra.mxu1 %v2338_v33 }
 0x138   :  { %347 = vmatpush.msra.mxu1 %v2341_v34 }
 0x139   :  { %1934 = vmatmul.msk.f32.gmra.mxu1 %vm208_vm3, %v2347_v35 }
 0x141   :  { %1935 = vmatmul.msk.f32.gmra.mxu1 %vm208_vm3, %v2356_v36 }
 0x149   :  { %1936 = vmatmul.msk.f32.gmra.mxu1 %vm208_vm3, %v2363_v37 }
 0x151   :  { %1947 = vmatmul.msk.f32.vlgmr.msra.gmra.mxu1 %vm168_vm2, %v2370_v38 }
 0x159   :  { %1948 = vmatmul.msk.f32.gmra.mxu1 %vm168_vm2, %v2377_v39 }
 0x1ae   :  { %v238_v40 = vpop.f32.mrf.mxu1 }
 0x1b6   :  { %v241_v41 = vpop.f32.mrf.mxu1 }
 0x1be   :  { %v244_v42 = vpop.f32.mrf.mxu1 }
 0x1c6   :  { %v247_v43 = vpop.f32.mrf.mxu1 }
 0x1c7   :  { %294 = vmatpush.msrb.mxu3 %v247_v43 }
 0x1c9   :  { %295 = vmatpush.msrb.mxu3 %v244_v42 }
 0x1cb   :  { %296 = vmatpush.msrb.mxu3 %v241_v41 }
 0x1cd   :  { %297 = vmatpush.msrb.mxu3 %v238_v40 }
 0x1ce   :  { %1937 = vmatmul.msk.f32.vlgmr.msrb.gmra.mxu3 %vm168_vm2, %v2384_v44  ;;  %v349_v45 = vpop.f32.mrf.mxu1 }
 0x1cf   :  { %v365_v51 = vmul.f32 %v1949_v49, %v349_v45  ;;  %776 = vmatpush.msra.mxu3 %v138_v60 }
 0x1d1   :  { %777 = vmatpush.msra.mxu3 %v137_v61 }
 0x1d3   :  { %778 = vmatpush.msra.mxu3 %v136_v62 }
 0x1d5   :  { %779 = vmatpush.msra.mxu3 %v135_v1 }
 0x1d6   :  { %1938 = vmatmul.msk.f32.gmra.mxu3 %vm168_vm2, %v2391_v46  ;;  %v352_v48 = vpop.f32.mrf.mxu1 }
 0x1d7   :  { %v366_v50 = vmul.f32 %v1950_v47, %v352_v48 }
 0x1d9   :  { %393 = vmatpush.msra.mxu2 %v366_v50 }
 0x1db   :  { %394 = vmatpush.msra.mxu2 %v365_v51 }
 0x1dc   :  { %1957 = vmatmul.msk.f32.vlgmr.msra.gmra.mxu2 %vm208_vm3, %v2404_v52 }
 0x1dd   :  { %711 = vmatpush.msrb.mxu2 %v143_v53 }
 0x1de   :  { %1939 = vmatmul.msk.f32.gmra.mxu3 %vm168_vm2, %v2409_v54 }
 0x1df   :  { %712 = vmatpush.msrb.mxu2 %v142_v55 }
 0x1e1   :  { %713 = vmatpush.msrb.mxu2 %v141_v56 }
 0x1e3   :  { %714 = vmatpush.msrb.mxu2 %v140_v57 }
 0x1e4   :  { %1958 = vmatmul.msk.f32.gmra.mxu2 %vm208_vm3, %v2418_v58 }
 0x1e6   :  { %1940 = vmatmul.msk.f32.gmra.mxu3 %vm168_vm2, %v2423_v59 }
 0x1ec   :  { %1959 = vmatmul.msk.f32.gmra.mxu2 %vm208_vm3, %v2432_v63 }
 0x1ee   :  { %1941 = vmatmul.msk.f32.gmra.mxu3 %vm168_vm2, %v2437_v0 }
 0x1f4   :  { %1960 = vmatmul.msk.f32.gmra.mxu2 %vm208_vm3, %v2446_v2 }
 0x1f6   :  { %1942 = vmatmul.msk.f32.gmra.mxu3 %vm168_vm2, %v2451_v3 }
 0x1fc   :  { %1993 = vmatmul.msk.f32.vlgmr.msrb.gmra.mxu2 %vm168_vm2, %v238_v40 }
 0x1fe   :  { %1943 = vmatmul.msk.f32.gmra.mxu3 %vm168_vm2, %v2460_v4 }
 0x204   :  { %1994 = vmatmul.msk.f32.gmra.mxu2 %vm168_vm2, %v241_v41 }
 0x206   :  { %1944 = vmatmul.msk.f32.gmra.mxu3 %vm168_vm2, %v2468_v5 }
 0x20c   :  { %1995 = vmatmul.msk.f32.gmra.mxu2 %vm168_vm2, %v244_v42 }
 0x20e   :  { %2001 = vmatmul.msk.f32.vlgmr.msra.gmra.mxu3 %vm168_vm2, %v2303_v17 }
 0x214   :  { %1996 = vmatmul.msk.f32.gmra.mxu2 %vm168_vm2, %v247_v43 }
 0x216   :  { %2002 = vmatmul.msk.f32.gmra.mxu3 %vm168_vm2, %v2300_v16 }
 0x21e   :  { %2003 = vmatmul.msk.f32.gmra.mxu3 %vm168_vm2, %v2297_v15 }
 0x226   :  { %2004 = vmatmul.msk.f32.gmra.mxu3 %vm168_vm2, %v2295_v14 }
 0x22e   :  { %2005 = vmatmul.msk.f32.gmra.mxu3 %vm168_vm2, %v2341_v34 }
 0x236   :  { %2006 = vmatmul.msk.f32.gmra.mxu3 %vm168_vm2, %v2338_v33 }
 0x23e   :  { %2007 = vmatmul.msk.f32.gmra.mxu3 %vm168_vm2, %v2334_v32 }
 0x246   :  { %2008 = vmatmul.msk.f32.gmra.mxu3 %vm168_vm2, %v2332_v31 }
 0x251   :  { %v2540_v23 = vpop.f32.mrf.mxu3 }
 0x252   :  { %1977 = vmatmul.msk.f32.vlgmr.msrb.gmra.mxu0 %vm168_vm2, %v2540_v23 }
 0x259   :  { %v2560_v28 = vpop.f32.mrf.mxu3 }
 0x25a   :  { %1978 = vmatmul.msk.f32.gmra.mxu0 %vm168_vm2, %v2560_v28 }
 0x25f   :  { %v396_v6 = vpop.f32.mrf.mxu2 }
 0x260   :  { %1997 = vmatmul.msk.f32.gmra.mxu2 %vm168_vm2, %v396_v6 }
 0x261   :  { %v2571_v40 = vpop.f32.mrf.mxu3 }
 0x262   :  { %1979 = vmatmul.msk.f32.gmra.mxu0 %vm168_vm2, %v2571_v40 }
 0x267   :  { %v399_v7 = vpop.f32.mrf.mxu2 }
 0x268   :  { %1998 = vmatmul.msk.f32.gmra.mxu2 %vm168_vm2, %v399_v7 }
 0x269   :  { %v2575_v41 = vpop.f32.mrf.mxu3 }
 0x26a   :  { %1980 = vmatmul.msk.f32.gmra.mxu0 %vm168_vm2, %v2575_v41 }
 0x26f   :  { %v402_v8 = vpop.f32.mrf.mxu2 }
 0x270   :  { %1999 = vmatmul.msk.f32.gmra.mxu2 %vm168_vm2, %v402_v8 }
 0x271   :  { %v311_v48 = vpop.f32.mrf.mxu3 }
 0x277   :  { %v405_v9 = vpop.f32.mrf.mxu2 }
 0x278   :  { %453 = vmatpush.msrb.mxu1 %v405_v9  ;;  %2000 = vmatmul.msk.f32.gmra.mxu2 %vm168_vm2, %v405_v9 }
 0x279   :  { %v314_v49 = vpop.f32.mrf.mxu3 }
 0x27a   :  { %454 = vmatpush.msrb.mxu1 %v402_v8 }
 0x27c   :  { %455 = vmatpush.msrb.mxu1 %v399_v7 }
 0x27e   :  { %456 = vmatpush.msrb.mxu1 %v396_v6 }
 0x27f   :  { %1969 = vmatmul.msk.f32.vlgmr.msrb.gmra.mxu1 %vm168_vm2, %v2498_v10 }
 0x281   :  { %v2597_v50 = vpop.f32.mrf.mxu3 }
 0x287   :  { %1970 = vmatmul.msk.f32.gmra.mxu1 %vm168_vm2, %v2505_v11 }
 0x289   :  { %v2601_v51 = vpop.f32.mrf.mxu3 }
 0x28f   :  { %1971 = vmatmul.msk.f32.gmra.mxu1 %vm168_vm2, %v2512_v12 }
 0x297   :  { %1972 = vmatmul.msk.f32.gmra.mxu1 %vm168_vm2, %v2519_v13  ;;  %v145_v13 = vld [vmem:[#allocation2 + $0x40] sm:$0xff] }
 0x29f   :  { %1973 = vmatmul.msk.f32.gmra.mxu1 %vm168_vm2, %v2526_v20 }
 0x2a7   :  { %1974 = vmatmul.msk.f32.gmra.mxu1 %vm168_vm2, %v2533_v21 }
 0x2af   :  { %1975 = vmatmul.msk.f32.gmra.mxu1 %vm168_vm2, %v2551_v26 }
 0x2b7   :  { %1976 = vmatmul.msk.f32.gmra.mxu1 %vm168_vm2, %v2565_v29 }
 0x2cf   :  { %v547_v60 = vpop.f32.mrf.mxu0 }
 0x2d7   :  { %v550_v61 = vpop.f32.mrf.mxu0 }
 0x2df   :  { %v553_v62 = vpop.f32.mrf.mxu0 }
 0x2e7   :  { %v556_v1 = vpop.f32.mrf.mxu0 }
 0x2fc   :  { %v2579_v42 = vpop.f32.mrf.mxu1 }
 0x2fd   :  { %1981 = vmatmul.msk.f32.gmra.mxu0 %vm168_vm2, %v2579_v42 }
 0x304   :  { %v2583_v43 = vpop.f32.mrf.mxu1 }
 0x305   :  { %1982 = vmatmul.msk.f32.gmra.mxu0 %vm168_vm2, %v2583_v43 }
 0x30c   :  { %v2587_v45 = vpop.f32.mrf.mxu1 }
 0x30d   :  { %1983 = vmatmul.msk.f32.gmra.mxu0 %vm168_vm2, %v2587_v45 }
 0x314   :  { %v2591_v47 = vpop.f32.mrf.mxu1 }
 0x315   :  { %1984 = vmatmul.msk.f32.gmra.mxu0 %vm168_vm2, %v2591_v47 }
 0x31c   :  { %v2603_v53 = vpop.f32.mrf.mxu1 }
 0x31d   :  { %1985 = vmatmul.msk.f32.gmra.mxu0 %vm168_vm2, %v311_v48 }
 0x324   :  { %v2609_v55 = vpop.f32.mrf.mxu1 }
 0x325   :  { %1986 = vmatmul.msk.f32.gmra.mxu0 %vm168_vm2, %v314_v49 }
 0x32c   :  { %v2613_v56 = vpop.f32.mrf.mxu1 }
 0x32d   :  { %1987 = vmatmul.msk.f32.gmra.mxu0 %vm168_vm2, %v2597_v50 }
 0x334   :  { %v2617_v57 = vpop.f32.mrf.mxu1 }
 0x335   :  { %1988 = vmatmul.msk.f32.gmra.mxu0 %vm168_vm2, %v2601_v51 }
 0x33d   :  { %1989 = vmatmul.msk.f32.gmra.mxu0 %vm168_vm2, %v2603_v53 }
 0x345   :  { %1990 = vmatmul.msk.f32.gmra.mxu0 %vm168_vm2, %v2609_v55 }
 0x34d   :  { %1991 = vmatmul.msk.f32.gmra.mxu0 %vm168_vm2, %v2613_v56 }
 0x355   :  { %1992 = vmatmul.msk.f32.gmra.mxu0 %vm168_vm2, %v2617_v57 }
 0x37a   :  { %v2621_v6 = vpop.f32.mrf.mxu0 }
 0x382   :  { %v2623_v7 = vpop.f32.mrf.mxu0 }
 0x38a   :  { %v2625_v8 = vpop.f32.mrf.mxu0 }
 0x392   :  { %v2627_v9 = vpop.f32.mrf.mxu0 }
 0x39a   :  { %v571_v22 = vpop.f32.mrf.mxu0 }
 0x39b   :  { %603 = vrot.lane.b32.xlu0 %v571_v22, %s2203_s4  ;;  %v148_v22 = vld [vmem:[#allocation2 + $0x58] sm:$0xff] }
 0x39c   :  { %841 = vmatpush.msra.mxu1 %v148_v22 }
 0x3a2   :  { %v574_v24 = vpop.f32.mrf.mxu0 }
 0x3a3   :  { %605 = vrot.lane.b32.xlu0 %v574_v24, %s2203_s4  ;;  %v147_v24 = vld [vmem:[#allocation2 + $0x50] sm:$0xff] }
 0x3a4   :  { %842 = vmatpush.msra.mxu1 %v147_v24 }
 0x3aa   :  { %v577_v25 = vpop.f32.mrf.mxu0 }
 0x3ab   :  { %607 = vrot.lane.b32.xlu1 %v577_v25, %s2203_s4  ;;  %v146_v25 = vld [vmem:[#allocation2 + $0x48] sm:$0xff] }
 0x3ac   :  { %843 = vmatpush.msra.mxu1 %v146_v25 }
 0x3ae   :  { %844 = vmatpush.msra.mxu1 %v145_v13 }
 0x3b2   :  { %v580_v27 = vpop.f32.mrf.mxu0 }
 0x3b3   :  { %609 = vrot.lane.b32.xlu1 %v580_v27, %s2203_s4 }
 0x3ba   :  { %v583_v29 = vpop.f32.mrf.mxu0 }
 0x3bb   :  { %611 = vrot.lane.b32.xlu2 %v583_v29, %s2203_s4 }
 0x3c2   :  { %v586_v26 = vpop.f32.mrf.mxu0 }
 0x3c3   :  { %613 = vrot.lane.b32.xlu2 %v586_v26, %s2203_s4 }
 0x3ca   :  { %v589_v21 = vpop.f32.mrf.mxu0 }
 0x3cb   :  { %615 = vrot.lane.b32.xlu0 %v589_v21, %s2203_s4 }
 0x3d2   :  { %v592_v20 = vpop.f32.mrf.mxu0 }
 0x3d3   :  { %617 = vrot.lane.b32.xlu1 %v592_v20, %s2203_s4 }
 0x40d   :  { %v604_v27 = vpop.permute.xlu0 %603 }
 0x40e   :  { %v627_v12 = vsub.f32 %v547_v60, %v604_v27  ;;  %v643_v29 = vadd.f32 %v604_v27, %v547_v60 }
 0x410   :  { %v635_v5 = vmul.f32 %v627_v12, %v2540_v23  ;;  %v651_v26 = vmul.f32 %v643_v29, %v311_v48 }
 0x412   :  { %v659_v11 = vadd.f32 %v651_v26, %v635_v5 }
 0x414   :  { %2142 = vtanh.f32 %v659_v11 }
 0x415   :  { %v606_v21 = vpop.permute.xlu0 %605  ;;  %v612_v23 = vpop.permute.xlu2 %611 }
 0x416   :  { %v628_v4 = vsub.f32 %v550_v61, %v606_v21  ;;  %v644_v10 = vadd.f32 %v606_v21, %v550_v61  ;;  %v631_v48 = vsub.f32 %v2621_v6, %v612_v23 }
 0x418   :  { %v636_v20 = vmul.f32 %v628_v4, %v2560_v28  ;;  %v652_v22 = vmul.f32 %v644_v10, %v314_v49 }
 0x41a   :  { %v2143_v3 = vpop.eup %2142  ;;  %v660_v24 = vadd.f32 %v652_v22, %v636_v20 }
 0x41b   :  { %2009 = vmatmul.msk.f32.vlgmr.msra.gmra.mxu1 %vm168_vm2, %v2143_v3  ;;  %v647_v3 = vadd.f32 %v612_v23, %v2621_v6  ;;  %v152_v23 = vld [vmem:[#allocation2 + $0x70] sm:$0xff] }
 0x41c   :  { %2144 = vtanh.f32 %v660_v24 }
 0x41d   :  { %v608_v13 = vpop.permute.xlu1 %607  ;;  %v614_v27 = vpop.permute.xlu2 %613 }
 0x41e   :  { %v629_v25 = vsub.f32 %v553_v62, %v608_v13  ;;  %v645_v0 = vadd.f32 %v608_v13, %v553_v62  ;;  %v648_v26 = vadd.f32 %v614_v27, %v2623_v7 }
 0x420   :  { %v637_v60 = vmul.f32 %v629_v25, %v2571_v40  ;;  %v653_v12 = vmul.f32 %v645_v0, %v2597_v50  ;;  %v639_v0 = vmul.f32 %v631_v48, %v2579_v42  ;;  %v655_v50 = vmul.f32 %v647_v3, %v2603_v53  ;;  %v2135_v3 = vld [vmem:[%s3016_s8] ss:$0 sm:$0xff] }
 0x422   :  { %v2145_v5 = vpop.eup %2144  ;;  %v661_v11 = vadd.f32 %v653_v12, %v637_v60  ;;  %v663_v29 = vadd.f32 %v655_v50, %v639_v0 }
 0x423   :  { %2010 = vmatmul.msk.f32.gmra.mxu1 %vm168_vm2, %v2145_v5 }
 0x424   :  { %2146 = vtanh.f32 %v661_v11 }
 0x425   :  { %v610_v4 = vpop.permute.xlu1 %609 }
 0x426   :  { %v630_v10 = vsub.f32 %v556_v1, %v610_v4  ;;  %v646_v28 = vadd.f32 %v610_v4, %v556_v1  ;;  %v632_v1 = vsub.f32 %v2623_v7, %v614_v27  ;;  %v151_v4 = vld [vmem:[#allocation2 + $0x68] sm:$0xff] }
 0x428   :  { %v638_v49 = vmul.f32 %v630_v10, %v2575_v41  ;;  %v654_v61 = vmul.f32 %v646_v28, %v2601_v51  ;;  %v640_v41 = vmul.f32 %v632_v1, %v2583_v43  ;;  %v656_v51 = vmul.f32 %v648_v26, %v2609_v55  ;;  %v150_v10 = vld [vmem:[#allocation2 + $0x60] sm:$0xff] }
 0x42a   :  { %v2147_v40 = vpop.eup %2146  ;;  %v662_v62 = vadd.f32 %v654_v61, %v638_v49  ;;  %v664_v21 = vadd.f32 %v656_v51, %v640_v41 }
 0x42b   :  { %2011 = vmatmul.msk.f32.gmra.mxu1 %vm168_vm2, %v2147_v40 }
 0x42c   :  { %2148 = vtanh.f32 %v662_v62 }
 0x42d   :  { %2150 = vtanh.f32 %v663_v29 }
 0x42e   :  { %2152 = vtanh.f32 %v664_v21 }
 0x432   :  { %v2149_v6 = vpop.eup %2148 }
 0x433   :  { %2012 = vmatmul.msk.f32.gmra.mxu1 %vm168_vm2, %v2149_v6  ;;  %v2151_v20 = vpop.eup %2150 }
 0x434   :  { %v2153_v13 = vpop.eup %2152 }
 0x43b   :  { %2013 = vmatmul.msk.f32.gmra.mxu1 %vm168_vm2, %v2151_v20 }
 0x43d   :  { %v616_v42 = vpop.permute.xlu0 %615 }
 0x43e   :  { %v633_v53 = vsub.f32 %v2625_v8, %v616_v42  ;;  %v649_v22 = vadd.f32 %v616_v42, %v2625_v8 }
 0x440   :  { %v641_v7 = vmul.f32 %v633_v53, %v2587_v45  ;;  %v657_v24 = vmul.f32 %v649_v22, %v2613_v56  ;;  %v153_v56 = vld [vmem:[#allocation2 + $0x78] sm:$0xff] }
 0x441   :  { %932 = vmatpush.msra.mxu2 %v153_v56 }
 0x442   :  { %v665_v25 = vadd.f32 %v657_v24, %v641_v7 }
 0x443   :  { %2014 = vmatmul.msk.f32.gmra.mxu1 %vm168_vm2, %v2153_v13  ;;  %933 = vmatpush.msra.mxu2 %v152_v23 }
 0x444   :  { %2154 = vtanh.f32 %v665_v25 }
 0x445   :  { %v618_v43 = vpop.permute.xlu1 %617  ;;  %934 = vmatpush.msra.mxu2 %v151_v4 }
 0x446   :  { %v634_v55 = vsub.f32 %v2627_v9, %v618_v43  ;;  %v650_v60 = vadd.f32 %v618_v43, %v2627_v9  ;;  %v716_v9 = vpop.f32.mrf.mxu2 }
 0x447   :  { %935 = vmatpush.msra.mxu2 %v150_v10 }
 0x448   :  { %v642_v12 = vmul.f32 %v634_v55, %v2591_v47  ;;  %v658_v5 = vmul.f32 %v650_v60, %v2617_v57  ;;  %v781_v47 = vpop.f32.mrf.mxu3 }
 0x449   :  { %v782_v48 = vadd.f32 %v781_v47, %v716_v9 }
 0x44a   :  { %v2155_v11 = vpop.eup %2154  ;;  %v666_v8 = vadd.f32 %v658_v5, %v642_v12  ;;  %v158_v5 = vld [vmem:[#allocation2 + $0x98] sm:$0xff] }
 0x44b   :  { %2015 = vmatmul.msk.f32.gmra.mxu1 %vm168_vm2, %v2155_v11  ;;  %1005 = vmatpush.msrb.mxu3 %v158_v5 }
 0x44c   :  { %2156 = vtanh.f32 %v666_v8 }
 0x44e   :  { %v719_v28 = vpop.f32.mrf.mxu2 }
 0x450   :  { %v784_v57 = vpop.f32.mrf.mxu3 }
 0x451   :  { %v785_v27 = vadd.f32 %v784_v57, %v719_v28 }
 0x452   :  { %v2157_v45 = vpop.eup %2156 }
 0x453   :  { %2016 = vmatmul.msk.f32.gmra.mxu1 %vm168_vm2, %v2157_v45 }
 0x456   :  { %v722_v62 = vpop.f32.mrf.mxu2 }
 0x458   :  { %v787_v0 = vpop.f32.mrf.mxu3 }
 0x459   :  { %v788_v21 = vadd.f32 %v787_v0, %v722_v62 }
 0x45e   :  { %v725_v41 = vpop.f32.mrf.mxu2 }
 0x460   :  { %v790_v51 = vpop.f32.mrf.mxu3 }
 0x461   :  { %v791_v24 = vadd.f32 %v790_v51, %v725_v41 }
 0x466   :  { %v728_v7 = vpop.f32.mrf.mxu2 }
 0x468   :  { %v793_v13 = vpop.f32.mrf.mxu3 }
 0x469   :  { %v794_v12 = vadd.f32 %v793_v13, %v728_v7 }
 0x46e   :  { %v731_v11 = vpop.f32.mrf.mxu2 }
 0x470   :  { %v796_v56 = vpop.f32.mrf.mxu3 }
 0x471   :  { %v797_v10 = vadd.f32 %v796_v56, %v731_v11 }
 0x476   :  { %v734_v28 = vpop.f32.mrf.mxu2 }
 0x498   :  { %v846_v49 = vpop.f32.mrf.mxu1 }
 0x499   :  { %v870_v61 = vadd.f32 %v846_v49, %v782_v48  ;;  %v799_v48 = vpop.f32.mrf.mxu3 }
 0x49b   :  { %v879_v40 = vadd.f32 %v2135_v3, %v870_v61  ;;  %v800_v61 = vadd.f32 %v799_v48, %v734_v28 }
 0x49d   :  { %v887_v50 = vmax.f32 %v879_v40, 0.0 }
 0x49f   :  { %2017 = vmatmul.msk.f32.vlgmr.msra.gmra.mxu2 %vm168_vm2, %v887_v50  ;;  %v737_v50 = vpop.f32.mrf.mxu2 }
 0x4a0   :  { %v849_v29 = vpop.f32.mrf.mxu1 }
 0x4a1   :  { %v871_v1 = vadd.f32 %v849_v29, %v785_v27  ;;  %v802_v29 = vpop.f32.mrf.mxu3 }
 0x4a3   :  { %v880_v26 = vadd.f32 %v2135_v3, %v871_v1  ;;  %v803_v1 = vadd.f32 %v802_v29, %v737_v50  ;;  %v2137_v50 = vld [vmem:[%s3016_s8 + $0x2] ss:$0 sm:$0xff] }
 0x4a5   :  { %v888_v6 = vmax.f32 %v880_v26, 0.0 }
 0x4a7   :  { %2018 = vmatmul.msk.f32.gmra.mxu2 %vm168_vm2, %v888_v6 }
 0x4a8   :  { %v852_v20 = vpop.f32.mrf.mxu1 }
 0x4a9   :  { %v872_v42 = vadd.f32 %v852_v20, %v788_v21  ;;  %v157_v21 = vld [vmem:[#allocation2 + $0x90] sm:$0xff]  ;;  %v156_v20 = vld [vmem:[#allocation2 + $0x88] sm:$0xff] }
 0x4aa   :  { %1006 = vmatpush.msrb.mxu3 %v157_v21 }
 0x4ab   :  { %v881_v53 = vadd.f32 %v2135_v3, %v872_v42  ;;  %v155_v42 = vld [vmem:[#allocation2 + $0x80] sm:$0xff] }
 0x4ac   :  { %1007 = vmatpush.msrb.mxu3 %v156_v20 }
 0x4ad   :  { %v889_v22 = vmax.f32 %v881_v53, 0.0  ;;  %v2136_v53 = vld [vmem:[%s3016_s8 + $0x1] ss:$0 sm:$0xff] }
 0x4ae   :  { %1008 = vmatpush.msrb.mxu3 %v155_v42 }
 0x4af   :  { %2019 = vmatmul.msk.f32.gmra.mxu2 %vm168_vm2, %v889_v22 }
 0x4b0   :  { %v855_v25 = vpop.f32.mrf.mxu1 }
 0x4b1   :  { %v873_v43 = vadd.f32 %v855_v25, %v791_v24 }
 0x4b3   :  { %v882_v55 = vadd.f32 %v2135_v3, %v873_v43 }
 0x4b5   :  { %v890_v60 = vmax.f32 %v882_v55, 0.0 }
 0x4b7   :  { %2020 = vmatmul.msk.f32.gmra.mxu2 %vm168_vm2, %v890_v60 }
 0x4b8   :  { %v858_v8 = vpop.f32.mrf.mxu1 }
 0x4b9   :  { %v874_v45 = vadd.f32 %v858_v8, %v794_v12 }
 0x4bb   :  { %v883_v23 = vadd.f32 %v2135_v3, %v874_v45 }
 0x4bd   :  { %v891_v4 = vmax.f32 %v883_v23, 0.0 }
 0x4bf   :  { %2021 = vmatmul.msk.f32.gmra.mxu2 %vm168_vm2, %v891_v4 }
 0x4c0   :  { %v861_v9 = vpop.f32.mrf.mxu1 }
 0x4c1   :  { %v875_v47 = vadd.f32 %v861_v9, %v797_v10 }
 0x4c3   :  { %v884_v57 = vadd.f32 %v2135_v3, %v875_v47 }
 0x4c5   :  { %v892_v49 = vmax.f32 %v884_v57, 0.0 }
 0x4c7   :  { %2022 = vmatmul.msk.f32.gmra.mxu2 %vm168_vm2, %v892_v49 }
 0x4c8   :  { %v864_v40 = vpop.f32.mrf.mxu1 }
 0x4c9   :  { %v876_v62 = vadd.f32 %v864_v40, %v800_v61 }
 0x4cb   :  { %v885_v0 = vadd.f32 %v2135_v3, %v876_v62 }
 0x4cd   :  { %v893_v27 = vmax.f32 %v885_v0, 0.0 }
 0x4cf   :  { %2023 = vmatmul.msk.f32.gmra.mxu2 %vm168_vm2, %v893_v27 }
 0x4d0   :  { %v867_v26 = vpop.f32.mrf.mxu1 }
 0x4d1   :  { %v877_v6 = vadd.f32 %v867_v26, %v803_v1 }
 0x4d3   :  { %v886_v41 = vadd.f32 %v2135_v3, %v877_v6 }
 0x4d5   :  { %v894_v51 = vmax.f32 %v886_v41, 0.0 }
 0x4d7   :  { %2024 = vmatmul.msk.f32.gmra.mxu2 %vm168_vm2, %v894_v51 }
 0x522   :  { %v937_v22 = vpop.f32.mrf.mxu2 }
 0x523   :  { %v938_v7 = vadd.f32 %v2136_v53, %v937_v22 }
 0x525   :  { %v961_v24 = vmax.f32 %v938_v7, 0.0 }
 0x527   :  { %2025 = vmatmul.msk.f32.vlgmr.msrb.gmra.mxu3 %vm168_vm2, %v961_v24 }
 0x52a   :  { %v940_v13 = vpop.f32.mrf.mxu2 }
 0x52b   :  { %v941_v3 = vadd.f32 %v2136_v53, %v940_v13 }
 0x52d   :  { %v962_v25 = vmax.f32 %v941_v3, 0.0 }
 0x52f   :  { %2026 = vmatmul.msk.f32.gmra.mxu3 %vm168_vm2, %v962_v25  ;;  %v1951_v25 = vld [vmem:[%s3011_s3 + $0x30] sm:$0xff] }
 0x532   :  { %v943_v43 = vpop.f32.mrf.mxu2 }
 0x533   :  { %v944_v55 = vadd.f32 %v2136_v53, %v943_v43 }
 0x535   :  { %v963_v60 = vmax.f32 %v944_v55, 0.0 }
 0x537   :  { %2027 = vmatmul.msk.f32.gmra.mxu3 %vm168_vm2, %v963_v60  ;;  %v1057_v60 = vld [vmem:[#allocation2 + $0xc0] sm:$0xff] }
 0x53a   :  { %v946_v12 = vpop.f32.mrf.mxu2 }
 0x53b   :  { %v947_v5 = vadd.f32 %v2136_v53, %v946_v12 }
 0x53d   :  { %v964_v11 = vmax.f32 %v947_v5, 0.0 }
 0x53f   :  { %2028 = vmatmul.msk.f32.gmra.mxu3 %vm168_vm2, %v964_v11 }
 0x542   :  { %v949_v8 = vpop.f32.mrf.mxu2 }
 0x543   :  { %v950_v45 = vadd.f32 %v2136_v53, %v949_v8  ;;  %v1054_v8 = vld [vmem:[#allocation2 + $0xb0] sm:$0xff] }
 0x545   :  { %v965_v56 = vmax.f32 %v950_v45, 0.0  ;;  %v1053_v45 = vld [vmem:[#allocation2 + $0xa8] sm:$0xff] }
 0x547   :  { %2029 = vmatmul.msk.f32.gmra.mxu3 %vm168_vm2, %v965_v56  ;;  %v1052_v56 = vld [vmem:[#allocation2 + $0xa0] sm:$0xff] }
 0x54a   :  { %v952_v23 = vpop.f32.mrf.mxu2 }
 0x54b   :  { %v953_v4 = vadd.f32 %v2136_v53, %v952_v23  ;;  %v3044_v23 = vld [vmem:[#allocation9_spill] sm:$0xff] }
 0x54d   :  { %v966_v10 = vmax.f32 %v953_v4, 0.0  ;;  %v3045_v4 = vld [vmem:[#allocation7_spill] sm:$0xff] }
 0x54f   :  { %2030 = vmatmul.msk.f32.gmra.mxu3 %vm168_vm2, %v966_v10  ;;  %v3046_v10 = vld [vmem:[#allocation10_spill] sm:$0xff] }
 0x552   :  { %v955_v9 = vpop.f32.mrf.mxu2 }
 0x553   :  { %v956_v47 = vadd.f32 %v2136_v53, %v955_v9  ;;  %v3047_v9 = vld [vmem:[#allocation8_spill] sm:$0xff] }
 0x555   :  { %v967_v28 = vmax.f32 %v956_v47, 0.0  ;;  %v3048_v47 = vld [vmem:[#allocation11_spill] sm:$0xff] }
 0x557   :  { %2031 = vmatmul.msk.f32.gmra.mxu3 %vm168_vm2, %v967_v28  ;;  %v3049_v28 = vld [vmem:[#allocation12_spill] sm:$0xff] }
 0x55a   :  { %v958_v57 = vpop.f32.mrf.mxu2 }
 0x55b   :  { %v959_v48 = vadd.f32 %v2136_v53, %v958_v57  ;;  %v3050_v57 = vld [vmem:[#allocation13_spill] sm:$0xff] }
 0x55d   :  { %v968_v49 = vmax.f32 %v959_v48, 0.0  ;;  %v3051_v48 = vld [vmem:[#allocation14_spill] sm:$0xff] }
 0x55f   :  { %2032 = vmatmul.msk.f32.gmra.mxu3 %vm168_vm2, %v968_v49  ;;  %v3052_v49 = vld [vmem:[#allocation15_spill] sm:$0xff] }
 0x5aa   :  { %v1010_v61 = vpop.f32.mrf.mxu3 }
 0x5ab   :  { %v1034_v6 = vadd.f32 %v1010_v61, %v2303_v17  ;;  %v3053_v61 = vld [vmem:[#allocation16_spill] sm:$0xff] }
 0x5ad   :  { %v2704_v20 = vadd.f32 %v2137_v50, %v1034_v6 }
 0x5b2   :  { %v1013_v40 = vpop.f32.mrf.mxu3 }
 0x5b3   :  { %v1035_v1 = vadd.f32 %v1013_v40, %v2300_v16  ;;  %v2036_v40 = vld [vmem:[%s3014_s6 + $0x38] sm:$0xff] }
 0x5b5   :  { %v2701_v51 = vadd.f32 %v2137_v50, %v1035_v1 }
 0x5ba   :  { %v1016_v62 = vpop.f32.mrf.mxu3 }
 0x5bb   :  { %v1036_v27 = vadd.f32 %v1016_v62, %v2297_v15  ;;  %v2035_v62 = vld [vmem:[%s3014_s6 + $0x30] sm:$0xff] }
 0x5bd   :  { %v2698_v41 = vadd.f32 %v2137_v50, %v1036_v27 }
 0x5c2   :  { %v1019_v0 = vpop.f32.mrf.mxu3 }
 0x5c3   :  { %v1037_v29 = vadd.f32 %v1019_v0, %v2295_v14  ;;  %v2034_v0 = vld [vmem:[%s3014_s6 + $0x28] sm:$0xff] }
 0x5c5   :  { %v2695_v26 = vadd.f32 %v2137_v50, %v1037_v29 }
 0x5c7   :  { %1096 = vmatpush.msrb.mxu1 %v2695_v26 }
 0x5c9   :  { %1097 = vmatpush.msrb.mxu1 %v2698_v41 }
 0x5ca   :  { %v1022_v21 = vpop.f32.mrf.mxu3 }
 0x5cb   :  { %1098 = vmatpush.msrb.mxu1 %v2701_v51  ;;  %v1038_v7 = vadd.f32 %v1022_v21, %v2341_v34 }
 0x5cd   :  { %1099 = vmatpush.msrb.mxu1 %v2704_v20 }
 0x5ce   :  { %2037 = vmatmul.msk.f32.vlgmr.msrb.gmra.mxu1 %vm168_vm2, %v2309_v18 }
 0x5d2   :  { %v1025_v14 = vpop.f32.mrf.mxu3 }
 0x5d3   :  { %v1039_v53 = vadd.f32 %v1025_v14, %v2338_v33  ;;  %v201_v33 = vld [vmem:[%s3011_s3 + $0x18] sm:$0xff] }
 0x5d5   :  { %v2721_v18 = vadd.f32 %v2137_v50, %v1039_v53 }
 0x5d6   :  { %2038 = vmatmul.msk.f32.gmra.mxu1 %vm168_vm2, %v2317_v19  ;;  %v2724_v19 = vadd.f32 %v2137_v50, %v1038_v7 }
 0x5da   :  { %v1028_v15 = vpop.f32.mrf.mxu3 }
 0x5db   :  { %v1040_v17 = vadd.f32 %v1028_v15, %v2334_v32  ;;  %v200_v32 = vld [vmem:[%s3011_s3 + $0x10] sm:$0xff] }
 0x5dd   :  { %v2718_v24 = vadd.f32 %v2137_v50, %v1040_v17 }
 0x5e2   :  { %v1031_v16 = vpop.f32.mrf.mxu3 }
 0x5e3   :  { %v1041_v42 = vadd.f32 %v1031_v16, %v2332_v31 }
 0x5e5   :  { %v2715_v22 = vadd.f32 %v2137_v50, %v1041_v42  ;;  %v2033_v50 = vld [vmem:[%s3014_s6 + $0x20] sm:$0xff] }
 0x5e7   :  { %1191 = vmatpush.msrb.mxu2 %v2715_v22 }
 0x5e9   :  { %1192 = vmatpush.msrb.mxu2 %v2718_v24 }
 0x5eb   :  { %1193 = vmatpush.msrb.mxu2 %v2721_v18 }
 0x5ed   :  { %1194 = vmatpush.msrb.mxu2 %v2724_v19 }
 0x5ee   :  { %2051 = vmatmul.msk.f32.vlgmr.msrb.gmra.mxu2 %vm168_vm2, %v2370_v38 }
 0x5f6   :  { %2052 = vmatmul.msk.f32.gmra.mxu2 %vm168_vm2, %v2377_v39  ;;  %v1952_v39 = vld [vmem:[%s3011_s3 + $0x38] sm:$0xff] }
 0x64b   :  { %v1101_v31 = vpop.f32.mrf.mxu1 }
 0x64c   :  { %v1107_v13 = vmul.f32 %v1101_v31, %v200_v32 }
 0x653   :  { %v1104_v34 = vpop.f32.mrf.mxu1 }
 0x654   :  { %v1108_v3 = vmul.f32 %v1104_v34, %v201_v33 }
 0x656   :  { %1123 = vmatpush.msra.mxu1 %v1108_v3 }
 0x658   :  { %1124 = vmatpush.msra.mxu1 %v1107_v13 }
 0x659   :  { %2039 = vmatmul.msk.f32.vlgmr.msra.gmra.mxu1 %vm208_vm3, %v2330_v30 }
 0x65a   :  { %1334 = vmatpush.msrb.mxu1 %v2036_v40 }
 0x65c   :  { %1335 = vmatpush.msrb.mxu1 %v2035_v62 }
 0x65e   :  { %1336 = vmatpush.msrb.mxu1 %v2034_v0 }
 0x660   :  { %1337 = vmatpush.msrb.mxu1 %v2033_v50 }
 0x661   :  { %2040 = vmatmul.msk.f32.gmra.mxu1 %vm208_vm3, %v2347_v35  ;;  %v1060_v35 = vld [vmem:[#allocation2 + $0xd8] sm:$0xff] }
 0x669   :  { %2041 = vmatmul.msk.f32.gmra.mxu1 %vm208_vm3, %v2356_v36  ;;  %v1059_v36 = vld [vmem:[#allocation2 + $0xd0] sm:$0xff] }
 0x671   :  { %2042 = vmatmul.msk.f32.gmra.mxu1 %vm208_vm3, %v2363_v37  ;;  %v1196_v38 = vpop.f32.mrf.mxu2  ;;  %v1058_v37 = vld [vmem:[#allocation2 + $0xc8] sm:$0xff] }
 0x672   :  { %v1202_v55 = vmul.f32 %v1951_v25, %v1196_v38 }
 0x679   :  { %v1199_v43 = vpop.f32.mrf.mxu2 }
 0x67a   :  { %v1203_v30 = vmul.f32 %v1952_v39, %v1199_v43 }
 0x67c   :  { %1218 = vmatpush.msra.mxu3 %v1203_v30 }
 0x67e   :  { %1219 = vmatpush.msra.mxu3 %v1202_v55 }
 0x67f   :  { %2053 = vmatmul.msk.f32.vlgmr.msra.gmra.mxu3 %vm208_vm3, %v2404_v52 }
 0x680   :  { %1503 = vmatpush.msrb.mxu3 %v1060_v35 }
 0x682   :  { %1504 = vmatpush.msrb.mxu3 %v1059_v36 }
 0x684   :  { %1505 = vmatpush.msrb.mxu3 %v1058_v37 }
 0x686   :  { %1506 = vmatpush.msrb.mxu3 %v1057_v60 }
 0x687   :  { %2054 = vmatmul.msk.f32.gmra.mxu3 %vm208_vm3, %v2418_v58 }
 0x68f   :  { %2055 = vmatmul.msk.f32.gmra.mxu3 %vm208_vm3, %v2432_v63 }
 0x697   :  { %2056 = vmatmul.msk.f32.gmra.mxu3 %vm208_vm3, %v2446_v2  ;;  %v1055_v2 = vld [vmem:[#allocation2 + $0xb8] sm:$0xff] }
 0x6d6   :  { %v1126_v12 = vpop.f32.mrf.mxu1 }
 0x6d7   :  { %2081 = vmatmul.msk.f32.vlgmr.msrb.gmra.mxu3 %vm168_vm2, %v1126_v12 }
 0x6de   :  { %v1129_v52 = vpop.f32.mrf.mxu1 }
 0x6df   :  { %2082 = vmatmul.msk.f32.gmra.mxu3 %vm168_vm2, %v1129_v52 }
 0x6e6   :  { %v1132_v5 = vpop.f32.mrf.mxu1 }
 0x6e7   :  { %2083 = vmatmul.msk.f32.gmra.mxu3 %vm168_vm2, %v1132_v5 }
 0x6ee   :  { %v1135_v11 = vpop.f32.mrf.mxu1 }
 0x6ef   :  { %1150 = vmatpush.msra.mxu0 %v1135_v11  ;;  %2084 = vmatmul.msk.f32.gmra.mxu3 %vm168_vm2, %v1135_v11 }
 0x6f1   :  { %1151 = vmatpush.msra.mxu0 %v1132_v5 }
 0x6f3   :  { %1152 = vmatpush.msra.mxu0 %v1129_v52 }
 0x6f5   :  { %1153 = vmatpush.msra.mxu0 %v1126_v12 }
 0x6f6   :  { %2043 = vmatmul.msk.f32.vlgmr.msra.gmra.mxu0 %vm168_vm2, %v2384_v44 }
 0x6f7   :  { %1568 = vmatpush.msrb.mxu0 %v1055_v2  ;;  %v1063_v2 = vld [vmem:[#allocation2 + $0xe8] sm:$0xff] }
 0x6f9   :  { %1569 = vmatpush.msrb.mxu0 %v1054_v8  ;;  %v1062_v8 = vld [vmem:[#allocation2 + $0xe0] sm:$0xff] }
 0x6fb   :  { %1570 = vmatpush.msrb.mxu0 %v1053_v45 }
 0x6fd   :  { %1571 = vmatpush.msrb.mxu0 %v1052_v56 }
 0x6fe   :  { %2044 = vmatmul.msk.f32.gmra.mxu0 %vm168_vm2, %v2391_v46  ;;  %v3042_v46 = vld [vmem:[#allocation5_spill] sm:$0xff] }
 0x702   :  { %v1221_v58 = vpop.f32.mrf.mxu3 }
 0x703   :  { %2085 = vmatmul.msk.f32.gmra.mxu3 %vm168_vm2, %v1221_v58 }
 0x706   :  { %2045 = vmatmul.msk.f32.gmra.mxu0 %vm168_vm2, %v2409_v54 }
 0x70a   :  { %v1224_v63 = vpop.f32.mrf.mxu3 }
 0x70b   :  { %2086 = vmatmul.msk.f32.gmra.mxu3 %vm168_vm2, %v1224_v63 }
 0x70e   :  { %2046 = vmatmul.msk.f32.gmra.mxu0 %vm168_vm2, %v2423_v59  ;;  %v3043_v59 = vld [vmem:[#allocation6_spill] sm:$0xff] }
 0x712   :  { %v1227_v44 = vpop.f32.mrf.mxu3 }
 0x713   :  { %2087 = vmatmul.msk.f32.gmra.mxu3 %vm168_vm2, %v1227_v44 }
 0x716   :  { %2047 = vmatmul.msk.f32.gmra.mxu0 %vm168_vm2, %v3042_v46 }
 0x71a   :  { %v1230_v54 = vpop.f32.mrf.mxu3 }
 0x71b   :  { %1245 = vmatpush.msra.mxu2 %v1230_v54  ;;  %2088 = vmatmul.msk.f32.gmra.mxu3 %vm168_vm2, %v1230_v54 }
 0x71d   :  { %1246 = vmatpush.msra.mxu2 %v1227_v44 }
 0x71e   :  { %2048 = vmatmul.msk.f32.gmra.mxu0 %vm168_vm2, %v3043_v59 }
 0x71f   :  { %1247 = vmatpush.msra.mxu2 %v1224_v63  ;;  %v1064_v63 = vld [vmem:[#allocation2 + $0xf0] sm:$0xff] }
 0x721   :  { %1248 = vmatpush.msra.mxu2 %v1221_v58  ;;  %v1065_v58 = vld [vmem:[#allocation2 + $0xf8] sm:$0xff] }
 0x722   :  { %2057 = vmatmul.msk.f32.vlgmr.msra.gmra.mxu2 %vm168_vm2, %v3044_v23 }
 0x723   :  { %1633 = vmatpush.msrb.mxu2 %v1065_v58 }
 0x725   :  { %1634 = vmatpush.msrb.mxu2 %v1064_v63 }
 0x726   :  { %2049 = vmatmul.msk.f32.gmra.mxu0 %vm168_vm2, %v3045_v4 }
 0x727   :  { %1635 = vmatpush.msrb.mxu2 %v1063_v2 }
 0x729   :  { %1636 = vmatpush.msrb.mxu2 %v1062_v8 }
 0x72a   :  { %2058 = vmatmul.msk.f32.gmra.mxu2 %vm168_vm2, %v3046_v10 }
 0x72e   :  { %2050 = vmatmul.msk.f32.gmra.mxu0 %vm168_vm2, %v3047_v9 }
 0x732   :  { %2059 = vmatmul.msk.f32.gmra.mxu2 %vm168_vm2, %v3048_v47 }
 0x736   :  { %2089 = vmatmul.msk.f32.vlgmr.msrb.gmra.mxu0 %vm168_vm2, %v2704_v20 }
 0x73a   :  { %2060 = vmatmul.msk.f32.gmra.mxu2 %vm168_vm2, %v3049_v28 }
 0x73e   :  { %2090 = vmatmul.msk.f32.gmra.mxu0 %vm168_vm2, %v2701_v51 }
 0x742   :  { %2061 = vmatmul.msk.f32.gmra.mxu2 %vm168_vm2, %v3050_v57 }
 0x746   :  { %2091 = vmatmul.msk.f32.gmra.mxu0 %vm168_vm2, %v2698_v41 }
 0x74a   :  { %2062 = vmatmul.msk.f32.gmra.mxu2 %vm168_vm2, %v3051_v48 }
 0x74e   :  { %2092 = vmatmul.msk.f32.gmra.mxu0 %vm168_vm2, %v2695_v26 }
 0x752   :  { %2063 = vmatmul.msk.f32.gmra.mxu2 %vm168_vm2, %v3052_v49 }
 0x756   :  { %2093 = vmatmul.msk.f32.gmra.mxu0 %vm168_vm2, %v2724_v19 }
 0x75a   :  { %2064 = vmatmul.msk.f32.gmra.mxu2 %vm168_vm2, %v3053_v61 }
 0x75e   :  { %2094 = vmatmul.msk.f32.gmra.mxu0 %vm168_vm2, %v2721_v18 }
 0x766   :  { %2095 = vmatmul.msk.f32.gmra.mxu0 %vm168_vm2, %v2718_v24 }
 0x76e   :  { %2096 = vmatmul.msk.f32.gmra.mxu0 %vm168_vm2, %v2715_v22 }
 0x773   :  { %v2828_v27 = vpop.f32.mrf.mxu0 }
 0x774   :  { %2065 = vmatmul.msk.f32.vlgmr.msrb.gmra.mxu1 %vm168_vm2, %v2828_v27 }
 0x77b   :  { %v2832_v29 = vpop.f32.mrf.mxu0 }
 0x77c   :  { %2066 = vmatmul.msk.f32.gmra.mxu1 %vm168_vm2, %v2832_v29 }
 0x783   :  { %v2836_v1 = vpop.f32.mrf.mxu0 }
 0x784   :  { %2067 = vmatmul.msk.f32.gmra.mxu1 %vm168_vm2, %v2836_v1 }
 0x78b   :  { %v2840_v6 = vpop.f32.mrf.mxu0 }
 0x78c   :  { %2068 = vmatmul.msk.f32.gmra.mxu1 %vm168_vm2, %v2840_v6 }
 0x793   :  { %v1167_v17 = vpop.f32.mrf.mxu0 }
 0x79b   :  { %v1170_v42 = vpop.f32.mrf.mxu0 }
 0x7a3   :  { %v2862_v53 = vpop.f32.mrf.mxu0 }
 0x7a5   :  { %v2844_v21 = vpop.f32.mrf.mxu2 }
 0x7a6   :  { %2069 = vmatmul.msk.f32.gmra.mxu1 %vm168_vm2, %v2844_v21 }
 0x7ab   :  { %v2866_v7 = vpop.f32.mrf.mxu0 }
 0x7ad   :  { %v2848_v14 = vpop.f32.mrf.mxu2 }
 0x7ae   :  { %2070 = vmatmul.msk.f32.gmra.mxu1 %vm168_vm2, %v2848_v14 }
 0x7b5   :  { %v2852_v15 = vpop.f32.mrf.mxu2 }
 0x7b6   :  { %2071 = vmatmul.msk.f32.gmra.mxu1 %vm168_vm2, %v2852_v15 }
 0x7bd   :  { %v2856_v16 = vpop.f32.mrf.mxu2 }
 0x7be   :  { %2072 = vmatmul.msk.f32.gmra.mxu1 %vm168_vm2, %v2856_v16 }
 0x7c5   :  { %v2868_v31 = vpop.f32.mrf.mxu2 }
 0x7c6   :  { %2073 = vmatmul.msk.f32.gmra.mxu1 %vm168_vm2, %v1167_v17 }
 0x7cd   :  { %v2874_v32 = vpop.f32.mrf.mxu2 }
 0x7ce   :  { %2074 = vmatmul.msk.f32.gmra.mxu1 %vm168_vm2, %v1170_v42 }
 0x7d5   :  { %v2878_v33 = vpop.f32.mrf.mxu2 }
 0x7d6   :  { %2075 = vmatmul.msk.f32.gmra.mxu1 %vm168_vm2, %v2862_v53 }
 0x7dd   :  { %v2882_v34 = vpop.f32.mrf.mxu2 }
 0x7de   :  { %2076 = vmatmul.msk.f32.gmra.mxu1 %vm168_vm2, %v2866_v7 }
 0x7e6   :  { %2077 = vmatmul.msk.f32.gmra.mxu1 %vm168_vm2, %v2868_v31 }
 0x7ee   :  { %2078 = vmatmul.msk.f32.gmra.mxu1 %vm168_vm2, %v2874_v32 }
 0x7f1   :  { %v1339_v13 = vpop.f32.mrf.mxu1 }
 0x7f6   :  { %2079 = vmatmul.msk.f32.gmra.mxu1 %vm168_vm2, %v2878_v33 }
 0x7f9   :  { %v1342_v3 = vpop.f32.mrf.mxu1 }
 0x7fe   :  { %2080 = vmatmul.msk.f32.gmra.mxu1 %vm168_vm2, %v2882_v34 }
 0x801   :  { %v1345_v38 = vpop.f32.mrf.mxu1 }
 0x809   :  { %v1348_v39 = vpop.f32.mrf.mxu1 }
 0x823   :  { %v2886_v25 = vpop.f32.mrf.mxu1 }
 0x82b   :  { %v2888_v43 = vpop.f32.mrf.mxu1 }
 0x833   :  { %v2890_v30 = vpop.f32.mrf.mxu1 }
 0x83b   :  { %v2892_v55 = vpop.f32.mrf.mxu1 }
 0x843   :  { %v1363_v35 = vpop.f32.mrf.mxu1 }
 0x844   :  { %1395 = vrot.lane.b32.xlu2 %v1363_v35, %s2203_s4 }
 0x84b   :  { %v1366_v36 = vpop.f32.mrf.mxu1 }
 0x84c   :  { %1397 = vrot.lane.b32.xlu0 %v1366_v36, %s2203_s4 }
 0x853   :  { %v1369_v37 = vpop.f32.mrf.mxu1 }
 0x854   :  { %1399 = vrot.lane.b32.xlu1 %v1369_v37, %s2203_s4 }
 0x85b   :  { %v1372_v60 = vpop.f32.mrf.mxu1 }
 0x85c   :  { %1401 = vrot.lane.b32.xlu2 %v1372_v60, %s2203_s4 }
 0x863   :  { %v1375_v12 = vpop.f32.mrf.mxu1 }
 0x864   :  { %1403 = vrot.lane.b32.xlu0 %v1375_v12, %s2203_s4 }
 0x86b   :  { %v1378_v52 = vpop.f32.mrf.mxu1 }
 0x86c   :  { %1405 = vrot.lane.b32.xlu1 %v1378_v52, %s2203_s4 }
 0x873   :  { %v1381_v5 = vpop.f32.mrf.mxu1 }
 0x874   :  { %1407 = vrot.lane.b32.xlu2 %v1381_v5, %s2203_s4 }
 0x87b   :  { %v1384_v11 = vpop.f32.mrf.mxu1 }
 0x87c   :  { %1409 = vrot.lane.b32.xlu0 %v1384_v11, %s2203_s4 }
 0x89e   :  { %v1396_v44 = vpop.permute.xlu2 %1395 }
 0x89f   :  { %v1419_v45 = vsub.f32 %v1339_v13, %v1396_v44  ;;  %v1435_v56 = vadd.f32 %v1396_v44, %v1339_v13 }
 0x8a1   :  { %v1427_v46 = vmul.f32 %v1419_v45, %v2828_v27  ;;  %v1443_v54 = vmul.f32 %v1435_v56, %v1167_v17 }
 0x8a3   :  { %v1451_v59 = vadd.f32 %v1443_v54, %v1427_v46  ;;  %v1069_v54 = vld [vmem:[#allocation2 + $0x110] sm:$0xff] }
 0x8a5   :  { %2158 = vtanh.f32 %v1451_v59  ;;  %v1068_v59 = vld [vmem:[#allocation2 + $0x108] sm:$0xff] }
 0x8ab   :  { %v2159_v23 = vpop.eup %2158 }
 0x8ac   :  { %2097 = vmatmul.msk.f32.vlgmr.msrb.gmra.mxu2 %vm168_vm2, %v2159_v23  ;;  %v1067_v23 = vld [vmem:[#allocation2 + $0x100] sm:$0xff] }
 0x8b6   :  { %v1402_v48 = vpop.permute.xlu2 %1401 }
 0x8b7   :  { %v1422_v62 = vsub.f32 %v1348_v39, %v1402_v48  ;;  %v1438_v0 = vadd.f32 %v1402_v48, %v1348_v39 }
 0x8be   :  { %v1398_v4 = vpop.permute.xlu0 %1397 }
 0x8bf   :  { %v1420_v10 = vsub.f32 %v1342_v3, %v1398_v4  ;;  %v1436_v9 = vadd.f32 %v1398_v4, %v1342_v3  ;;  %v1430_v3 = vmul.f32 %v1422_v62, %v2840_v6 }
 0x8c1   :  { %v1428_v47 = vmul.f32 %v1420_v10, %v2832_v29  ;;  %v1444_v28 = vmul.f32 %v1436_v9, %v1170_v42  ;;  %v1446_v29 = vmul.f32 %v1438_v0, %v2866_v7 }
 0x8c3   :  { %v1452_v57 = vadd.f32 %v1444_v28, %v1428_v47  ;;  %v1454_v42 = vadd.f32 %v1446_v29, %v1430_v3 }
 0x8c5   :  { %2160 = vtanh.f32 %v1452_v57 }
 0x8c6   :  { %v1400_v49 = vpop.permute.xlu1 %1399 }
 0x8c7   :  { %v1421_v61 = vsub.f32 %v1345_v38, %v1400_v49  ;;  %v1437_v40 = vadd.f32 %v1400_v49, %v1345_v38 }
 0x8c9   :  { %v1429_v50 = vmul.f32 %v1421_v61, %v2836_v1  ;;  %v1445_v27 = vmul.f32 %v1437_v40, %v2862_v53 }
 0x8cb   :  { %v2161_v17 = vpop.eup %2160  ;;  %v1453_v13 = vadd.f32 %v1445_v27, %v1429_v50 }
 0x8cc   :  { %2098 = vmatmul.msk.f32.gmra.mxu2 %vm168_vm2, %v2161_v17 }
 0x8cd   :  { %2162 = vtanh.f32 %v1453_v13 }
 0x8ce   :  { %2164 = vtanh.f32 %v1454_v42  ;;  %v1408_v6 = vpop.permute.xlu2 %1407 }
 0x8cf   :  { %v1425_v5 = vsub.f32 %v2890_v30, %v1408_v6  ;;  %v1441_v11 = vadd.f32 %v1408_v6, %v2890_v30 }
 0x8d1   :  { %v1433_v63 = vmul.f32 %v1425_v5, %v2852_v15  ;;  %v1449_v2 = vmul.f32 %v1441_v11, %v2878_v33  ;;  %v1070_v33 = vld [vmem:[#allocation2 + $0x118] sm:$0xff] }
 0x8d2   :  { %1724 = vmatpush.msra.mxu3 %v1070_v33 }
 0x8d3   :  { %v2163_v35 = vpop.eup %2162  ;;  %v1457_v8 = vadd.f32 %v1449_v2, %v1433_v63 }
 0x8d4   :  { %2099 = vmatmul.msk.f32.gmra.mxu2 %vm168_vm2, %v2163_v35  ;;  %v2165_v37 = vpop.eup %2164  ;;  %1725 = vmatpush.msra.mxu3 %v1069_v54 }
 0x8d6   :  { %v1404_v38 = vpop.permute.xlu0 %1403  ;;  %1726 = vmatpush.msra.mxu3 %v1068_v59 }
 0x8d7   :  { %v1423_v39 = vsub.f32 %v2886_v25, %v1404_v38  ;;  %v1439_v1 = vadd.f32 %v1404_v38, %v2886_v25 }
 0x8d8   :  { %1727 = vmatpush.msra.mxu3 %v1067_v23 }
 0x8d9   :  { %v1431_v53 = vmul.f32 %v1423_v39, %v2844_v21  ;;  %v1447_v36 = vmul.f32 %v1439_v1, %v2868_v31 }
 0x8db   :  { %v1455_v60 = vadd.f32 %v1447_v36, %v1431_v53 }
 0x8dc   :  { %2100 = vmatmul.msk.f32.gmra.mxu2 %vm168_vm2, %v2165_v37 }
 0x8dd   :  { %2166 = vtanh.f32 %v1455_v60 }
 0x8de   :  { %v1406_v7 = vpop.permute.xlu1 %1405 }
 0x8df   :  { %v1424_v12 = vsub.f32 %v2888_v43, %v1406_v7  ;;  %v1440_v52 = vadd.f32 %v1406_v7, %v2888_v43 }
 0x8e1   :  { %v1432_v25 = vmul.f32 %v1424_v12, %v2848_v14  ;;  %v1448_v21 = vmul.f32 %v1440_v52, %v2874_v32  ;;  %v1075_v12 = vld [vmem:[#allocation2 + $0x138] sm:$0xff] }
 0x8e2   :  { %1797 = vmatpush.msra.mxu0 %v1075_v12  ;;  %v52_v12 = vld [vmem:[#allocation2 + $0x148] sm:$0xff] }
 0x8e3   :  { %v2167_v31 = vpop.eup %2166  ;;  %v1456_v58 = vadd.f32 %v1448_v21, %v1432_v25 }
 0x8e4   :  { %2101 = vmatmul.msk.f32.gmra.mxu2 %vm168_vm2, %v2167_v31 }
 0x8e5   :  { %2168 = vtanh.f32 %v1456_v58 }
 0x8e6   :  { %2170 = vtanh.f32 %v1457_v8 }
 0x8eb   :  { %v2169_v44 = vpop.eup %2168 }
 0x8ec   :  { %2102 = vmatmul.msk.f32.gmra.mxu2 %vm168_vm2, %v2169_v44  ;;  %v2171_v56 = vpop.eup %2170 }
 0x8ee   :  { %v1410_v43 = vpop.permute.xlu0 %1409 }
 0x8ef   :  { %v1426_v30 = vsub.f32 %v2892_v55, %v1410_v43  ;;  %v1442_v14 = vadd.f32 %v1410_v43, %v2892_v55  ;;  %v1573_v55 = vpop.f32.mrf.mxu0 }
 0x8f1   :  { %v1434_v32 = vmul.f32 %v1426_v30, %v2856_v16  ;;  %v1450_v45 = vmul.f32 %v1442_v14, %v2882_v34  ;;  %v1508_v16 = vpop.f32.mrf.mxu3  ;;  %v2138_v34 = vld [vmem:[%s3016_s8 + $0x3] ss:$0 sm:$0xff] }
 0x8f2   :  { %v1574_v4 = vadd.f32 %v1573_v55, %v1508_v16 }
 0x8f3   :  { %v1458_v46 = vadd.f32 %v1450_v45, %v1434_v32 }
 0x8f4   :  { %2103 = vmatmul.msk.f32.gmra.mxu2 %vm168_vm2, %v2171_v56 }
 0x8f5   :  { %2172 = vtanh.f32 %v1458_v46 }
 0x8f7   :  { %v1576_v57 = vpop.f32.mrf.mxu0 }
 0x8f9   :  { %v1511_v48 = vpop.f32.mrf.mxu3 }
 0x8fa   :  { %v1577_v40 = vadd.f32 %v1576_v57, %v1511_v48 }
 0x8fb   :  { %v2173_v15 = vpop.eup %2172 }
 0x8fc   :  { %2104 = vmatmul.msk.f32.gmra.mxu2 %vm168_vm2, %v2173_v15 }
 0x8ff   :  { %v1579_v49 = vpop.f32.mrf.mxu0 }
 0x901   :  { %v1514_v61 = vpop.f32.mrf.mxu3 }
 0x902   :  { %v1580_v3 = vadd.f32 %v1579_v49, %v1514_v61 }
 0x907   :  { %v1582_v27 = vpop.f32.mrf.mxu0 }
 0x909   :  { %v1517_v13 = vpop.f32.mrf.mxu3 }
 0x90a   :  { %v1583_v1 = vadd.f32 %v1582_v27, %v1517_v13  ;;  %v54_v13 = vld [vmem:[#allocation2 + $0x158] sm:$0xff] }
 0x90b   :  { %1880 = vmatpush.msra.mxu2 %v54_v13 }
 0x90f   :  { %v1585_v39 = vpop.f32.mrf.mxu0 }
 0x911   :  { %v1520_v53 = vpop.f32.mrf.mxu3 }
 0x912   :  { %v1586_v7 = vadd.f32 %v1585_v39, %v1520_v53 }
 0x917   :  { %v1588_v52 = vpop.f32.mrf.mxu0 }
 0x919   :  { %v1523_v25 = vpop.f32.mrf.mxu3 }
 0x91a   :  { %v1589_v58 = vadd.f32 %v1588_v52, %v1523_v25  ;;  %v51_v52 = vld [vmem:[#allocation2 + $0x140] sm:$0xff] }
 0x91f   :  { %v1591_v8 = vpop.f32.mrf.mxu0 }
 0x921   :  { %v1526_v43 = vpop.f32.mrf.mxu3 }
 0x922   :  { %v1592_v14 = vadd.f32 %v1591_v8, %v1526_v43 }
 0x927   :  { %v1594_v46 = vpop.f32.mrf.mxu0 }
 0x929   :  { %v1529_v33 = vpop.f32.mrf.mxu3 }
 0x92a   :  { %v1595_v54 = vadd.f32 %v1594_v46, %v1529_v33 }
 0x92f   :  { %v1638_v10 = vpop.f32.mrf.mxu2 }
 0x930   :  { %v1662_v9 = vadd.f32 %v1638_v10, %v1574_v4  ;;  %v1074_v4 = vld [vmem:[#allocation2 + $0x130] sm:$0xff]  ;;  %v1073_v10 = vld [vmem:[#allocation2 + $0x128] sm:$0xff] }
 0x931   :  { %1798 = vmatpush.msra.mxu0 %v1074_v4 }
 0x932   :  { %v1671_v47 = vadd.f32 %v2138_v34, %v1662_v9  ;;  %v1072_v9 = vld [vmem:[#allocation2 + $0x120] sm:$0xff] }
 0x933   :  { %1799 = vmatpush.msra.mxu0 %v1073_v10 }
 0x934   :  { %v1679_v28 = vmax.f32 %v1671_v47, 0.0  ;;  %v2139_v47 = vld [vmem:[%s3016_s8 + $0x4] ss:$0 sm:$0xff] }
 0x935   :  { %1800 = vmatpush.msra.mxu0 %v1072_v9 }
 0x936   :  { %2105 = vmatmul.msk.f32.vlgmr.msra.gmra.mxu3 %vm168_vm2, %v1679_v28 }
 0x94f   :  { %v1641_v62 = vpop.f32.mrf.mxu2 }
 0x950   :  { %v1663_v0 = vadd.f32 %v1641_v62, %v1577_v40 }
 0x952   :  { %v1672_v50 = vadd.f32 %v2138_v34, %v1663_v0 }
 0x954   :  { %v1680_v17 = vmax.f32 %v1672_v50, 0.0 }
 0x956   :  { %2106 = vmatmul.msk.f32.gmra.mxu3 %vm168_vm2, %v1680_v17 }
 0x957   :  { %v1644_v29 = vpop.f32.mrf.mxu2 }
 0x958   :  { %v1664_v42 = vadd.f32 %v1644_v29, %v1580_v3 }
 0x95a   :  { %v1673_v35 = vadd.f32 %v2138_v34, %v1664_v42 }
 0x95c   :  { %v1681_v38 = vmax.f32 %v1673_v35, 0.0 }
 0x95e   :  { %2107 = vmatmul.msk.f32.gmra.mxu3 %vm168_vm2, %v1681_v38 }
 0x95f   :  { %v1647_v36 = vpop.f32.mrf.mxu2 }
 0x960   :  { %v1665_v37 = vadd.f32 %v1647_v36, %v1583_v1 }
 0x962   :  { %v1674_v60 = vadd.f32 %v2138_v34, %v1665_v37 }
 0x964   :  { %v1682_v6 = vmax.f32 %v1674_v60, 0.0 }
 0x966   :  { %2108 = vmatmul.msk.f32.gmra.mxu3 %vm168_vm2, %v1682_v6 }
 0x967   :  { %v1650_v5 = vpop.f32.mrf.mxu2 }
 0x968   :  { %v1666_v11 = vadd.f32 %v1650_v5, %v1586_v7  ;;  %v53_v7 = vld [vmem:[#allocation2 + $0x150] sm:$0xff]  ;;  %v2140_v5 = vld [vmem:[%s3016_s8 + $0x5] ss:$0 sm:$0xff] }
 0x969   :  { %1881 = vmatpush.msra.mxu2 %v53_v7 }
 0x96a   :  { %v1675_v21 = vadd.f32 %v2138_v34, %v1666_v11 }
 0x96b   :  { %1882 = vmatpush.msra.mxu2 %v52_v12 }
 0x96c   :  { %v1683_v31 = vmax.f32 %v1675_v21, 0.0 }
 0x96d   :  { %1883 = vmatpush.msra.mxu2 %v51_v52 }
 0x96e   :  { %2109 = vmatmul.msk.f32.gmra.mxu3 %vm168_vm2, %v1683_v31 }
 0x96f   :  { %v1653_v63 = vpop.f32.mrf.mxu2 }
 0x970   :  { %v1667_v2 = vadd.f32 %v1653_v63, %v1589_v58 }
 0x972   :  { %v1676_v44 = vadd.f32 %v2138_v34, %v1667_v2 }
 0x974   :  { %v1684_v30 = vmax.f32 %v1676_v44, 0.0 }
 0x976   :  { %2110 = vmatmul.msk.f32.gmra.mxu3 %vm168_vm2, %v1684_v30 }
 0x977   :  { %v1656_v32 = vpop.f32.mrf.mxu2 }
 0x978   :  { %v1668_v45 = vadd.f32 %v1656_v32, %v1592_v14 }
 0x97a   :  { %v1677_v56 = vadd.f32 %v2138_v34, %v1668_v45 }
 0x97c   :  { %v1685_v15 = vmax.f32 %v1677_v56, 0.0 }
 0x97e   :  { %2111 = vmatmul.msk.f32.gmra.mxu3 %vm168_vm2, %v1685_v15 }
 0x97f   :  { %v1659_v59 = vpop.f32.mrf.mxu2 }
 0x980   :  { %v1669_v23 = vadd.f32 %v1659_v59, %v1595_v54 }
 0x982   :  { %v1678_v55 = vadd.f32 %v2138_v34, %v1669_v23 }
 0x984   :  { %v1686_v16 = vmax.f32 %v1678_v55, 0.0 }
 0x986   :  { %2112 = vmatmul.msk.f32.gmra.mxu3 %vm168_vm2, %v1686_v16 }
 0x9b9   :  { %v1729_v28 = vpop.f32.mrf.mxu3 }
 0x9ba   :  { %v1730_v57 = vadd.f32 %v2139_v47, %v1729_v28 }
 0x9bc   :  { %v1753_v48 = vmax.f32 %v1730_v57, 0.0 }
 0x9be   :  { %2113 = vmatmul.msk.f32.vlgmr.msra.gmra.mxu0 %vm168_vm2, %v1753_v48 }
 0x9d9   :  { %v1732_v49 = vpop.f32.mrf.mxu3 }
 0x9da   :  { %v1733_v34 = vadd.f32 %v2139_v47, %v1732_v49 }
 0x9dc   :  { %v1754_v61 = vmax.f32 %v1733_v34, 0.0 }
 0x9de   :  { %2114 = vmatmul.msk.f32.gmra.mxu0 %vm168_vm2, %v1754_v61 }
 0x9e1   :  { %v1735_v40 = vpop.f32.mrf.mxu3 }
 0x9e2   :  { %v1736_v62 = vadd.f32 %v2139_v47, %v1735_v40 }
 0x9e4   :  { %v1755_v0 = vmax.f32 %v1736_v62, 0.0 }
 0x9e6   :  { %2115 = vmatmul.msk.f32.gmra.mxu0 %vm168_vm2, %v1755_v0 }
 0x9e9   :  { %v1738_v50 = vpop.f32.mrf.mxu3 }
 0x9ea   :  { %v1739_v27 = vadd.f32 %v2139_v47, %v1738_v50 }
 0x9ec   :  { %v1756_v17 = vmax.f32 %v1739_v27, 0.0 }
 0x9ee   :  { %2116 = vmatmul.msk.f32.gmra.mxu0 %vm168_vm2, %v1756_v17 }
 0x9f1   :  { %v1741_v3 = vpop.f32.mrf.mxu3 }
 0x9f2   :  { %v1742_v29 = vadd.f32 %v2139_v47, %v1741_v3 }
 0x9f4   :  { %v1757_v42 = vmax.f32 %v1742_v29, 0.0 }
 0x9f6   :  { %2117 = vmatmul.msk.f32.gmra.mxu0 %vm168_vm2, %v1757_v42 }
 0x9f9   :  { %v1744_v35 = vpop.f32.mrf.mxu3 }
 0x9fa   :  { %v1745_v38 = vadd.f32 %v2139_v47, %v1744_v35 }
 0x9fc   :  { %v1758_v39 = vmax.f32 %v1745_v38, 0.0 }
 0x9fe   :  { %2118 = vmatmul.msk.f32.gmra.mxu0 %vm168_vm2, %v1758_v39 }
 0xa01   :  { %v1747_v1 = vpop.f32.mrf.mxu3 }
 0xa02   :  { %v1748_v53 = vadd.f32 %v2139_v47, %v1747_v1 }
 0xa04   :  { %v1759_v36 = vmax.f32 %v1748_v53, 0.0 }
 0xa06   :  { %2119 = vmatmul.msk.f32.gmra.mxu0 %vm168_vm2, %v1759_v36 }
 0xa09   :  { %v1750_v37 = vpop.f32.mrf.mxu3 }
 0xa0a   :  { %v1751_v60 = vadd.f32 %v2139_v47, %v1750_v37 }
 0xa0c   :  { %v1760_v6 = vmax.f32 %v1751_v60, 0.0 }
 0xa0e   :  { %2120 = vmatmul.msk.f32.gmra.mxu0 %vm168_vm2, %v1760_v6 }
 0xa3b   :  { %v1802_v11 = vpop.f32.mrf.mxu0 }
 0xa3c   :  { %v1826_v25 = vadd.f32 %v1802_v11, %v2704_v20 }
 0xa3e   :  { %v1835_v21 = vadd.f32 %v2140_v5, %v1826_v25 }
 0xa40   :  { %2121 = vmatmul.msk.f32.vlgmr.msra.gmra.mxu2 %vm168_vm2, %v1835_v21 }
 0xa5b   :  { %v1805_v31 = vpop.f32.mrf.mxu0 }
 0xa5c   :  { %v1827_v58 = vadd.f32 %v1805_v31, %v2701_v51 }
 0xa5e   :  { %v1836_v63 = vadd.f32 %v2140_v5, %v1827_v58 }
 0xa60   :  { %2122 = vmatmul.msk.f32.gmra.mxu2 %vm168_vm2, %v1836_v63 }
 0xa63   :  { %v1808_v2 = vpop.f32.mrf.mxu0 }
 0xa64   :  { %v1828_v8 = vadd.f32 %v1808_v2, %v2698_v41 }
 0xa66   :  { %v1837_v44 = vadd.f32 %v2140_v5, %v1828_v8 }
 0xa68   :  { %2123 = vmatmul.msk.f32.gmra.mxu2 %vm168_vm2, %v1837_v44 }
 0xa6b   :  { %v1811_v43 = vpop.f32.mrf.mxu0 }
 0xa6c   :  { %v1829_v30 = vadd.f32 %v1811_v43, %v2695_v26 }
 0xa6e   :  { %v1838_v14 = vadd.f32 %v2140_v5, %v1829_v30 }
 0xa70   :  { %2124 = vmatmul.msk.f32.gmra.mxu2 %vm168_vm2, %v1838_v14 }
 0xa73   :  { %v1814_v20 = vpop.f32.mrf.mxu0 }
 0xa74   :  { %v1830_v32 = vadd.f32 %v1814_v20, %v2724_v19  ;;  %v2141_v19 = vld [vmem:[%s3016_s8 + $0x7] ss:$0 sm:$0xff] }
 0xa76   :  { %v1839_v45 = vadd.f32 %v2140_v5, %v1830_v32 }
 0xa78   :  { %2125 = vmatmul.msk.f32.gmra.mxu2 %vm168_vm2, %v1839_v45 }
 0xa7b   :  { %v1817_v51 = vpop.f32.mrf.mxu0 }
 0xa7c   :  { %v1831_v56 = vadd.f32 %v1817_v51, %v2721_v18 }
 0xa7e   :  { %v1840_v46 = vadd.f32 %v2140_v5, %v1831_v56 }
 0xa80   :  { %2126 = vmatmul.msk.f32.gmra.mxu2 %vm168_vm2, %v1840_v46 }
 0xa83   :  { %v1820_v41 = vpop.f32.mrf.mxu0 }
 0xa84   :  { %v1832_v15 = vadd.f32 %v1820_v41, %v2718_v24 }
 0xa86   :  { %v1841_v33 = vadd.f32 %v2140_v5, %v1832_v15 }
 0xa88   :  { %2127 = vmatmul.msk.f32.gmra.mxu2 %vm168_vm2, %v1841_v33 }
 0xa8b   :  { %v1823_v26 = vpop.f32.mrf.mxu0 }
 0xa8c   :  { %v1833_v54 = vadd.f32 %v1823_v26, %v2715_v22 }
 0xa8e   :  { %v1842_v59 = vadd.f32 %v2140_v5, %v1833_v54 }
 0xa90   :  { %2128 = vmatmul.msk.f32.gmra.mxu2 %vm168_vm2, %v1842_v59 }
 0xac3   :  { %v1885_v18 = vpop.f32.mrf.mxu2 }
 0xac4   :  { %v1886_v23 = vadd.f32 %v2141_v19, %v1885_v18 }
 0xac6   :  { %1909 = vst.msk [vmem:[%s3017_s9] sm:$0xff] %vm168_vm2, %v1886_v23 }
 0xae3   :  { %v1888_v24 = vpop.f32.mrf.mxu2 }
 0xae4   :  { %v1889_v55 = vadd.f32 %v2141_v19, %v1888_v24 }
 0xae6   :  { %1910 = vst.msk [vmem:[%s3017_s9 + $0x8] sm:$0xff] %vm168_vm2, %v1889_v55 }
 0xaeb   :  { %v1891_v22 = vpop.f32.mrf.mxu2 }
 0xaec   :  { %v1892_v16 = vadd.f32 %v2141_v19, %v1891_v22 }
 0xaee   :  { %1911 = vst.msk [vmem:[%s3017_s9 + $0x10] sm:$0xff] %vm168_vm2, %v1892_v16 }
 0xaf3   :  { %v1894_v4 = vpop.f32.mrf.mxu2 }
 0xaf4   :  { %v1895_v10 = vadd.f32 %v2141_v19, %v1894_v4 }
 0xaf6   :  { %1912 = vst.msk [vmem:[%s3017_s9 + $0x18] sm:$0xff] %vm168_vm2, %v1895_v10 }
 0xafb   :  { %v1897_v9 = vpop.f32.mrf.mxu2 }
 0xafc   :  { %v1898_v47 = vadd.f32 %v2141_v19, %v1897_v9 }
 0xafe   :  { %1913 = vst.msk [vmem:[%s3017_s9 + $0x20] sm:$0xff] %vm168_vm2, %v1898_v47 }
 0xb03   :  { %v1900_v28 = vpop.f32.mrf.mxu2 }
 0xb04   :  { %v1901_v57 = vadd.f32 %v2141_v19, %v1900_v28 }
 0xb06   :  { %1914 = vst.msk [vmem:[%s3017_s9 + $0x28] sm:$0xff] %vm168_vm2, %v1901_v57 }
 0xb0b   :  { %v1903_v48 = vpop.f32.mrf.mxu2 }
 0xb0c   :  { %v1904_v49 = vadd.f32 %v2141_v19, %v1903_v48 }
 0xb0e   :  { %1915 = vst.msk [vmem:[%s3017_s9 + $0x30] sm:$0xff] %vm168_vm2, %v1904_v49 }
 0xb13   :  { %v1906_v34 = vpop.f32.mrf.mxu2 }
 0xb14   :  { %v1907_v61 = vadd.f32 %v2141_v19, %v1906_v34 }
 0xb16   :  { %1916 = vst.msk [vmem:[%s3017_s9 + $0x38] sm:$0xff] %vm168_vm2, %v1907_v61 }
 0xb17   :  { %1921 = vsyncpa [#allocation3], 1 }

</bundles_post_ra>
